<compile_context>
chip_gen: v7x
topology: tpu7x:2x2x1
jax: 0.10.0
libtpu: 0.0.40
codegen_flags: <defaults>
</compile_context>

<pallas_src>
import jax
import jax.numpy as jnp
from jax import lax
from jax.experimental import pallas as pl
from jax.experimental.pallas import tpu as pltpu

# --- model hyper-parameters (small, consistent with the module's forward) ---
B = 2            # batch
S = 8            # input_seq_len
INPUT_SIZE = 4   # input_size  (== number of task heads)
HIDDEN = 32      # hidden_size
NUM_LAYERS = 2   # num_layers
OUTPUT_SIZE = 1  # output_size (fc2 is created in __init__ but unused in forward)

SEQB = S * B          # flattened rows; time-major row index = t*B + b
G4 = 4 * HIDDEN       # 128 = gate width per layer

# ---- packed-slab layout (column offsets are 128-aligned) -------------------
# slab A: recurrence block matrix + block-diagonal stage-2 task head
OFFA_GATES = 0                    # (2H, 8H): [[whh0^T, wih1^T], [0, whh1^T]]
OFFA_HD2 = 2 * G4                 # (2H, 8*N) block-diagonal stage-2 weights
A_COLS = OFFA_HD2 + 128
A_BIAS_ROW = 2 * HIDDEN           # row 64 holds the bias for each column block
A_ROWS = A_BIAS_ROW + 1

# slab B: all 32-row (or 4-row) weights, their biases, and the attention mask
OFFB_FC1 = 0                      # fc1 weight^T (32, 32)
OFFB_QKV = 128                    # fused q/k/v in_proj^T (32, 96)
OFFB_HD1 = 256                    # out_proj folded into stage-1 head (32, 64)
OFFB_HD3 = 384                    # block-diagonal stage-3 head (32, 4)
OFFB_IH0 = 512                    # layer-0 input projection^T (4, 128)
OFFB_MASK = 640                   # additive attention mask (16, 16)
B_COLS = 768
B_BIAS_ROW = HIDDEN               # row 32 holds the bias for each column block
B_ROWS = B_BIAS_ROW + 1


# ----------------------------------------------------------------------------
# Fused kernel: 2-layer LSTM (wavefront) + fc1/LeakyReLU + attention + heads.
# ----------------------------------------------------------------------------
def fused_kernel(x_ref, h0_ref, c0_ref, wa_ref, wb_ref,
                 out_ref, hN_ref, cN_ref,
                 gx_sc, y1_sc, h3_sc):
    H = HIDDEN
    N = INPUT_SIZE

    # ---- hoisted layer-0 input projection for ALL time steps --------------
    # x rows are batch-major (row = b*S + t); gx keeps that layout.
    w_ih0 = wb_ref[0:N, OFFB_IH0:OFFB_IH0 + G4]                       # (4, 4H)
    b_g0 = wb_ref[B_BIAS_ROW:B_BIAS_ROW + 1, OFFB_IH0:OFFB_IH0 + G4]  # (1, 4H)
    gx_sc[...] = jnp.dot(x_ref[...], w_ih0,
                         preferred_element_type=jnp.float32) + b_g0

    # ---- merged 2-layer LSTM recurrence (wavefront, fully unrolled) -------
    w_rec = wa_ref[0:2 * H, OFFA_GATES:OFFA_GATES + 2 * G4]           # (64, 256)
    b_g1 = wa_ref[A_BIAS_ROW:A_BIAS_ROW + 1, G4:2 * G4]               # (1, 4H)

    h_l0 = h0_ref[0]
    c_l0 = c0_ref[0]
    h_l1 = h0_ref[1]
    c_l1 = c0_ref[1]

    def cell(gates, c_prev):
        # One sigmoid pass over the full 4H-wide gate slab (i/f/o lanes used),
        # tanh only on the g slice and on the new cell state.
        sg = jax.nn.sigmoid(gates)
        i_g = sg[:, 0:H]
        f_g = sg[:, H:2 * H]
        o_g = sg[:, 3 * H:4 * H]
        g_g = jnp.tanh(gates[:, 2 * H:3 * H])
        c_new = f_g * c_prev + i_g * g_g
        h_new = o_g * jnp.tanh(c_new)
        return h_new, c_new

    # Wavefront step w: layer0 processes time w (w < S), layer1 processes
    # time w-1 (w >= 1).  Both gate sets come from ONE block matmul whose lhs
    # is the pre-step state [h_l0 | h_l1] (y0[w-1] == h_l0 state).
    for w in range(S + 1):
        lhs = jnp.concatenate([h_l0, h_l1], axis=1)                   # (B, 2H)
        gates = jnp.dot(lhs, w_rec,
                        preferred_element_type=jnp.float32)           # (B, 8H)
        if w >= 1:
            h_l1, c_l1 = cell(gates[:, G4:2 * G4] + b_g1, c_l1)
            y1_sc[B * (w - 1):B * w, :] = h_l1                        # time-major
        if w < S:
            gx_t = gx_sc[pl.ds(w, B, stride=S), :]                    # rows {b*S+w}
            h_l0, c_l0 = cell(gates[:, 0:G4] + gx_t, c_l0)

    hN_ref[0] = h_l0
    hN_ref[1] = h_l1
    cN_ref[0] = c_l0
    cN_ref[1] = c_l1

    # ---- fc1 + LeakyReLU(0.01); fused q/k/v projection ---------------------
    y1 = y1_sc[...]                                                   # (S*B, H)
    a = jnp.dot(y1, wb_ref[0:H, OFFB_FC1:OFFB_FC1 + H],
                preferred_element_type=jnp.float32)
    a = a + wb_ref[B_BIAS_ROW:B_BIAS_ROW + 1, OFFB_FC1:OFFB_FC1 + H]
    a = jnp.where(a > 0, a, 0.01 * a)

    qkv = jnp.dot(a, wb_ref[0:H, OFFB_QKV:OFFB_QKV + 3 * H],
                  preferred_element_type=jnp.float32)
    qkv = qkv + wb_ref[B_BIAS_ROW:B_BIAS_ROW + 1, OFFB_QKV:OFFB_QKV + 3 * H]
    q = qkv[:, 0:H]
    k = qkv[:, H:2 * H]
    v = qkv[:, 2 * H:3 * H]

    # ---- single-head attention over the *batch* axis per time step --------
    # (faithful to the module's batch-first LSTM -> seq-first MHA mismatch)
    scale = HIDDEN ** -0.5
    scores = jnp.einsum('nd,md->nm', q, k,
                        preferred_element_type=jnp.float32) * scale   # (16,16)
    scores = scores + wb_ref[0:SEQB, OFFB_MASK:OFFB_MASK + SEQB]      # block mask
    m = jnp.max(scores, axis=-1, keepdims=True)
    e = jnp.exp(scores - m)
    denom = jnp.sum(e, axis=-1, keepdims=True)
    inv = pl.reciprocal(denom, approx=True)
    inv = inv * (2.0 - denom * inv)            # one Newton step (denom >= 1)
    probs = e * inv                            # off-block entries are exact 0
    ctx = jnp.dot(probs, v, preferred_element_type=jnp.float32)       # (16, H)

    # ---- 4 task heads; attention out-proj folded into stage 1 -------------
    h1 = jnp.dot(ctx, wb_ref[0:H, OFFB_HD1:OFFB_HD1 + 16 * N],
                 preferred_element_type=jnp.float32)
    h1 = jnp.maximum(
        h1 + wb_ref[B_BIAS_ROW:B_BIAS_ROW + 1, OFFB_HD1:OFFB_HD1 + 16 * N], 0.0)
    h2 = jnp.dot(h1, wa_ref[0:2 * H, OFFA_HD2:OFFA_HD2 + 8 * N],
                 preferred_element_type=jnp.float32)
    h2 = jnp.maximum(
        h2 + wa_ref[A_BIAS_ROW:A_BIAS_ROW + 1, OFFA_HD2:OFFA_HD2 + 8 * N], 0.0)
    h3 = jnp.dot(h2, wb_ref[0:H, OFFB_HD3:OFFB_HD3 + N],
                 preferred_element_type=jnp.float32)
    h3 = jnp.maximum(
        h3 + wb_ref[B_BIAS_ROW:B_BIAS_ROW + 1, OFFB_HD3:OFFB_HD3 + N], 0.0)

    # ---- time-major -> batch-major output via 2 strided reads -------------
    h3_sc[...] = h3
    for b in range(B):
        out_ref[b] = h3_sc[pl.ds(b, S, stride=B), :]


# ----------------------------------------------------------------------------
# Wrapper: single pallas_call, everything in VMEM, no grid.
# ----------------------------------------------------------------------------
def _forward_impl(x, h0, c0, wA, wB):
    x_flat = x.reshape(B * S, INPUT_SIZE)          # free batch-major flatten
    vmem = pl.BlockSpec(memory_space=pltpu.MemorySpace.VMEM)
    out, hN, cN = pl.pallas_call(
        fused_kernel,
        out_shape=(jax.ShapeDtypeStruct((B, S, INPUT_SIZE), jnp.float32),
                   jax.ShapeDtypeStruct((NUM_LAYERS, B, HIDDEN), jnp.float32),
                   jax.ShapeDtypeStruct((NUM_LAYERS, B, HIDDEN), jnp.float32)),
        in_specs=[vmem] * 5,
        out_specs=(vmem, vmem, vmem),
        scratch_shapes=[pltpu.VMEM((SEQB, 4 * HIDDEN), jnp.float32),   # gates(x)
                        pltpu.VMEM((SEQB, HIDDEN), jnp.float32),       # layer-1 y
                        pltpu.VMEM((SEQB, INPUT_SIZE), jnp.float32)],  # head out
        cost_estimate=pl.CostEstimate(flops=910_000,
                                      transcendentals=7_500,
                                      bytes_accessed=210_000),
    )(x_flat, h0, c0, wA, wB)
    return out, (hN, cN)


lstm_attention_forward = jax.jit(_forward_impl)


# ----------------------------------------------------------------------------
# One-time parameter packing into the two kernel slabs.
# ----------------------------------------------------------------------------
def prepare_kernel_params(p):
    H, N = HIDDEN, INPUT_SIZE
    wih0, whh0, bih0, bhh0 = p['lstm'][0]
    wih1, whh1, bih1, bhh1 = p['lstm'][1]

    # ---- slab A: merged recurrence block matrix + stage-2 head ------------
    A = jnp.zeros((A_ROWS, A_COLS), jnp.float32)
    A = A.at[0:H, 0:G4].set(whh0.T)                 # layer0: h_l0 @ whh0^T
    A = A.at[0:H, G4:2 * G4].set(wih1.T)            # layer1: y0    @ wih1^T
    A = A.at[H:2 * H, G4:2 * G4].set(whh1.T)        # layer1: h_l1  @ whh1^T
    A = A.at[A_BIAS_ROW, G4:2 * G4].set(bih1 + bhh1)
    for i in range(N):                              # block-diag stage-2 head
        A = A.at[16 * i:16 * (i + 1),
                 OFFA_HD2 + 8 * i:OFFA_HD2 + 8 * (i + 1)].set(p['wbT'][i])
    A = A.at[A_BIAS_ROW, OFFA_HD2:OFFA_HD2 + 8 * N].set(p['bb'].reshape(-1))

    # ---- slab B ------------------------------------------------------------
    Bm = jnp.zeros((B_ROWS, B_COLS), jnp.float32)
    Bm = Bm.at[0:H, OFFB_FC1:OFFB_FC1 + H].set(p['w1T'])
    Bm = Bm.at[B_BIAS_ROW, OFFB_FC1:OFFB_FC1 + H].set(p['b1'].reshape(-1))

    wqkv = jnp.concatenate([p['wqT'], p['wkT'], p['wvT']], axis=1)    # (32, 96)
    bqkv = jnp.concatenate([p['bq'], p['bk'], p['bv']], axis=1).reshape(-1)
    Bm = Bm.at[0:H, OFFB_QKV:OFFB_QKV + 3 * H].set(wqkv)
    Bm = Bm.at[B_BIAS_ROW, OFFB_QKV:OFFB_QKV + 3 * H].set(bqkv)

    wa_cat = jnp.transpose(p['waT'], (1, 0, 2)).reshape(H, 16 * N)    # (32, 64)
    ba_cat = p['ba'].reshape(-1)
    wo_a = p['woT'] @ wa_cat                        # fold attention out-proj
    b_a = (p['bo'] @ wa_cat).reshape(-1) + ba_cat
    Bm = Bm.at[0:H, OFFB_HD1:OFFB_HD1 + 16 * N].set(wo_a)
    Bm = Bm.at[B_BIAS_ROW, OFFB_HD1:OFFB_HD1 + 16 * N].set(b_a)

    for i in range(N):                              # block-diag stage-3 head
        Bm = Bm.at[8 * i:8 * (i + 1), OFFB_HD3 + i].set(p['wcT'][i].reshape(-1))
    Bm = Bm.at[B_BIAS_ROW, OFFB_HD3:OFFB_HD3 + N].set(p['bc'].reshape(-1))

    Bm = Bm.at[0:N, OFFB_IH0:OFFB_IH0 + G4].set(wih0.T)
    Bm = Bm.at[B_BIAS_ROW, OFFB_IH0:OFFB_IH0 + G4].set(bih0 + bhh0)

    # Additive attention mask (time-major rows t*B + b): 0 within the same
    # time step, -1e30 across time steps.
    t_idx = jnp.arange(SEQB, dtype=jnp.int32) // B
    mask_add = jnp.where(t_idx[:, None] == t_idx[None, :],
                         0.0, -1e30).astype(jnp.float32)
    Bm = Bm.at[0:SEQB, OFFB_MASK:OFFB_MASK + SEQB].set(mask_add)

    return {'wA': A, 'wB': Bm}


# ----------------------------------------------------------------------------
# Deterministic parameter initialization (synthetic, not a checkpoint).
# ----------------------------------------------------------------------------
def init_params(key):
    keys = jax.random.split(key, 32)
    it = iter(range(32))

    def nrm(shape, scale=0.1):
        return (scale * jax.random.normal(keys[next(it)], shape)).astype(jnp.float32)

    p = {}
    lstm = []
    for l in range(NUM_LAYERS):
        din = INPUT_SIZE if l == 0 else HIDDEN
        lstm.append((nrm((4 * HIDDEN, din)),     # weight_ih_l{k}
                     nrm((4 * HIDDEN, HIDDEN)),  # weight_hh_l{k}
                     nrm((4 * HIDDEN,)),         # bias_ih_l{k}
                     nrm((4 * HIDDEN,))))        # bias_hh_l{k}
    p['lstm'] = lstm
    # fc1 (stored pre-transposed: y = x @ W^T + b  ->  x @ w1T + b1)
    p['w1T'] = nrm((HIDDEN, HIDDEN)); p['b1'] = nrm((1, HIDDEN))
    # MultiheadAttention in_proj (q/k/v) and out_proj
    p['wqT'] = nrm((HIDDEN, HIDDEN)); p['bq'] = nrm((1, HIDDEN))
    p['wkT'] = nrm((HIDDEN, HIDDEN)); p['bk'] = nrm((1, HIDDEN))
    p['wvT'] = nrm((HIDDEN, HIDDEN)); p['bv'] = nrm((1, HIDDEN))
    p['woT'] = nrm((HIDDEN, HIDDEN)); p['bo'] = nrm((1, HIDDEN))
    # fc_task: INPUT_SIZE stacked FullyConnected heads (H->16->8->1)
    p['waT'] = nrm((INPUT_SIZE, HIDDEN, 16)); p['ba'] = nrm((INPUT_SIZE, 1, 16))
    p['wbT'] = nrm((INPUT_SIZE, 16, 8));      p['bb'] = nrm((INPUT_SIZE, 1, 8))
    p['wcT'] = nrm((INPUT_SIZE, 8, 1));       p['bc'] = nrm((INPUT_SIZE, 1, 1))
    return p


# ----------------------------------------------------------------------------
# Pure-JAX reference (mirrors PyTorch semantics) for correctness checking.
# ----------------------------------------------------------------------------
def reference_forward(x, h0, c0, p):
    Bn, Sn, _ = x.shape
    H = HIDDEN
    layer_in = x
    h_list, c_list = [], []
    for l in range(NUM_LAYERS):
        wih, whh, bih, bhh = p['lstm'][l]
        h, c = h0[l], c0[l]
        ys = []
        for t in range(Sn):
            xt = layer_in[:, t, :]
            gates = xt @ wih.T + h @ whh.T + bih + bhh
            i = jax.nn.sigmoid(gates[:, :H])
            f = jax.nn.sigmoid(gates[:, H:2 * H])
            g = jnp.tanh(gates[:, 2 * H:3 * H])
            o = jax.nn.sigmoid(gates[:, 3 * H:])
            c = f * c + i * g
            h = o * jnp.tanh(c)
            ys.append(h)
        layer_in = jnp.stack(ys, axis=1)
        h_list.append(h)
        c_list.append(c)
    h_out = jnp.stack(h_list)
    c_out = jnp.stack(c_list)

    a = layer_in @ p['w1T'] + p['b1']
    a = jnp.where(a > 0, a, 0.01 * a)
    q = a @ p['wqT'] + p['bq']
    k = a @ p['wkT'] + p['bk']
    v = a @ p['wvT'] + p['bv']
    scale = 1.0 / jnp.sqrt(jnp.float32(H))
    scores = jnp.einsum('bsh,csh->sbc', q, k) * scale   # attend over batch axis
    probs = jax.nn.softmax(scores, axis=-1)
    ctx = jnp.einsum('sbc,csh->bsh', probs, v)
    attn = ctx @ p['woT'] + p['bo']
    outs = []
    for i in range(INPUT_SIZE):
        h1 = jnp.maximum(attn @ p['waT'][i] + p['ba'][i], 0.0)
        h2 = jnp.maximum(h1 @ p['wbT'][i] + p['bb'][i], 0.0)
        h3 = jnp.maximum(h2 @ p['wcT'][i] + p['bc'][i], 0.0)
        outs.append(h3)
    out = jnp.concatenate(outs, axis=-1)
    return out, (h_out, c_out)


if __name__ == "__main__":
    key = jax.random.PRNGKey(0)
    kx, kh, kc, kparam = jax.random.split(key, 4)
    x = jax.random.normal(kx, (B, S, INPUT_SIZE), dtype=jnp.float32)
    h0 = 0.1 * jax.random.normal(kh, (NUM_LAYERS, B, HIDDEN), dtype=jnp.float32)
    c0 = 0.1 * jax.random.normal(kc, (NUM_LAYERS, B, HIDDEN), dtype=jnp.float32)
    params = init_params(kparam)
    kp = prepare_kernel_params(params)

    out, (h_out, c_out) = lstm_attention_forward(x, h0, c0, kp['wA'], kp['wB'])
    jax.block_until_ready((out, h_out, c_out))

    ref_out, (ref_h, ref_c) = reference_forward(x, h0, c0, params)
    assert out.shape == (B, S, INPUT_SIZE)
    assert h_out.shape == (NUM_LAYERS, B, HIDDEN)
    assert c_out.shape == (NUM_LAYERS, B, HIDDEN)
    ok = (bool(jnp.allclose(out, ref_out, atol=5e-4, rtol=5e-4))
          and bool(jnp.allclose(h_out, ref_h, atol=5e-4, rtol=5e-4))
          and bool(jnp.allclose(c_out, ref_c, atol=5e-4, rtol=5e-4)))
    if not ok:
        raise AssertionError("Pallas output mismatch vs JAX reference")
    print("KERNEL_OK")
</pallas_src>

<mosaic_0001>
module attributes {stable_mosaic.version = 11 : i64} {
  func.func @fused_kernel(%arg0: memref<16x4xf32, #tpu.memory_space<vmem>>, %arg1: memref<2x2x32xf32, #tpu.memory_space<vmem>>, %arg2: memref<2x2x32xf32, #tpu.memory_space<vmem>>, %arg3: memref<65x384xf32, #tpu.memory_space<vmem>>, %arg4: memref<33x768xf32, #tpu.memory_space<vmem>>, %arg5: memref<2x8x4xf32, #tpu.memory_space<vmem>>, %arg6: memref<2x2x32xf32, #tpu.memory_space<vmem>>, %arg7: memref<2x2x32xf32, #tpu.memory_space<vmem>>, %arg8: memref<16x128xf32, #tpu.memory_space<vmem>>, %arg9: memref<16x32xf32, #tpu.memory_space<vmem>>, %arg10: memref<16x4xf32, #tpu.memory_space<vmem>>) attributes {dimension_semantics = [], scalar_prefetch = 0 : i64, scratch_operands = 3 : i64, tpu.core_type = #tpu.core_type<tc>} {
    %c0 = arith.constant 0 : index
    %c512 = arith.constant 512 : index
    %0 = vector.load %arg4[%c0, %c512] : memref<33x768xf32, #tpu.memory_space<vmem>>, vector<4x128xf32>
    %c32 = arith.constant 32 : index
    %c512_0 = arith.constant 512 : index
    %1 = vector.load %arg4[%c32, %c512_0] : memref<33x768xf32, #tpu.memory_space<vmem>>, vector<1x128xf32>
    %c0_1 = arith.constant 0 : index
    %c0_2 = arith.constant 0 : index
    %2 = vector.load %arg0[%c0_1, %c0_2] : memref<16x4xf32, #tpu.memory_space<vmem>>, vector<16x4xf32>
    %cst = arith.constant dense<0.000000e+00> : vector<16x128xf32>
    %3 = tpu.matmul %2, %0, %cst {dimension_numbers = #tpu.dot_dimension_numbers<[1], [0], [0], [1], [0, 0, 1, 1], [], []>} : vector<16x4xf32>, vector<4x128xf32>, vector<16x128xf32> -> vector<16x128xf32>
    %4 = vector.broadcast %1 : vector<1x128xf32> to vector<16x128xf32>
    %5 = arith.addf %3, %4 : vector<16x128xf32>
    %c0_3 = arith.constant 0 : index
    %c0_4 = arith.constant 0 : index
    %6 = vector.load %arg8[%c0_3, %c0_4] : memref<16x128xf32, #tpu.memory_space<vmem>>, vector<16x128xf32>
    tpu.vector_store %arg8[%c0_3, %c0_4], %5 {strides = array<i32>} : memref<16x128xf32, #tpu.memory_space<vmem>>, vector<16x128xf32>,
    %c0_5 = arith.constant 0 : index
    %c0_6 = arith.constant 0 : index
    %7 = vector.load %arg3[%c0_5, %c0_6] : memref<65x384xf32, #tpu.memory_space<vmem>>, vector<64x256xf32>
    %c64 = arith.constant 64 : index
    %c128 = arith.constant 128 : index
    %8 = vector.load %arg3[%c64, %c128] : memref<65x384xf32, #tpu.memory_space<vmem>>, vector<1x128xf32>
    %c0_7 = arith.constant 0 : index
    %c0_8 = arith.constant 0 : index
    %c0_9 = arith.constant 0 : index
    %9 = vector.load %arg1[%c0_7, %c0_8, %c0_9] : memref<2x2x32xf32, #tpu.memory_space<vmem>>, vector<1x2x32xf32>
    %10 = vector.shape_cast %9 : vector<1x2x32xf32> to vector<2x32xf32>
    %c0_10 = arith.constant 0 : index
    %c0_11 = arith.constant 0 : index
    %c0_12 = arith.constant 0 : index
    %11 = vector.load %arg2[%c0_10, %c0_11, %c0_12] : memref<2x2x32xf32, #tpu.memory_space<vmem>>, vector<1x2x32xf32>
    %12 = vector.shape_cast %11 : vector<1x2x32xf32> to vector<2x32xf32>
    %c1 = arith.constant 1 : index
    %c0_13 = arith.constant 0 : index
    %c0_14 = arith.constant 0 : index
    %13 = vector.load %arg1[%c1, %c0_13, %c0_14] : memref<2x2x32xf32, #tpu.memory_space<vmem>>, vector<1x2x32xf32>
    %14 = vector.shape_cast %13 : vector<1x2x32xf32> to vector<2x32xf32>
    %c1_15 = arith.constant 1 : index
    %c0_16 = arith.constant 0 : index
    %c0_17 = arith.constant 0 : index
    %15 = vector.load %arg2[%c1_15, %c0_16, %c0_17] : memref<2x2x32xf32, #tpu.memory_space<vmem>>, vector<1x2x32xf32>
    %16 = vector.shape_cast %15 : vector<1x2x32xf32> to vector<2x32xf32>
    %17 = tpu.concatenate %10, %14 in 1 : vector<2x32xf32>, vector<2x32xf32> -> vector<2x64xf32>
    %cst_18 = arith.constant dense<0.000000e+00> : vector<2x256xf32>
    %18 = tpu.matmul %17, %7, %cst_18 {dimension_numbers = #tpu.dot_dimension_numbers<[1], [0], [0], [1], [0, 0, 1, 1], [], []>} : vector<2x64xf32>, vector<64x256xf32>, vector<2x256xf32> -> vector<2x256xf32>
    %c0_19 = arith.constant 0 : index
    %c0_20 = arith.constant 0 : index
    %19 = tpu.strided_load %arg8[%c0_19, %c0_20] {strides = array<i32: 8, 1>} : memref<16x128xf32, #tpu.memory_space<vmem>>, vector<2x128xf32>
    %20 = vector.extract_strided_slice %18 {offsets = [0, 0], sizes = [2, 128], strides = [1, 1]} : vector<2x256xf32> to vector<2x128xf32>
    %21 = arith.addf %20, %19 : vector<2x128xf32>
    %22 = arith.negf %21 : vector<2x128xf32>
    %23 = math.exp %22 : vector<2x128xf32>
    %cst_21 = arith.constant 1.000000e+00 : f32
    %24 = vector.broadcast %cst_21 : f32 to vector<2x128xf32>
    %25 = arith.addf %24, %23 : vector<2x128xf32>
    %26 = arith.divf %24, %25 : vector<2x128xf32>
    %27 = vector.extract_strided_slice %26 {offsets = [0, 0], sizes = [2, 32], strides = [1, 1]} : vector<2x128xf32> to vector<2x32xf32>
    %28 = vector.extract_strided_slice %26 {offsets = [0, 32], sizes = [2, 32], strides = [1, 1]} : vector<2x128xf32> to vector<2x32xf32>
    %29 = vector.extract_strided_slice %26 {offsets = [0, 96], sizes = [2, 32], strides = [1, 1]} : vector<2x128xf32> to vector<2x32xf32>
    %30 = vector.extract_strided_slice %21 {offsets = [0, 64], sizes = [2, 32], strides = [1, 1]} : vector<2x128xf32> to vector<2x32xf32>
    %31 = math.tanh %30 : vector<2x32xf32>
    %32 = arith.mulf %28, %12 : vector<2x32xf32>
    %33 = arith.mulf %27, %31 : vector<2x32xf32>
    %34 = arith.addf %32, %33 : vector<2x32xf32>
    %35 = math.tanh %34 : vector<2x32xf32>
    %36 = arith.mulf %29, %35 : vector<2x32xf32>
    %37 = tpu.concatenate %36, %14 in 1 : vector<2x32xf32>, vector<2x32xf32> -> vector<2x64xf32>
    %cst_22 = arith.constant dense<0.000000e+00> : vector<2x256xf32>
    %38 = tpu.matmul %37, %7, %cst_22 {dimension_numbers = #tpu.dot_dimension_numbers<[1], [0], [0], [1], [0, 0, 1, 1], [], []>} : vector<2x64xf32>, vector<64x256xf32>, vector<2x256xf32> -> vector<2x256xf32>
    %39 = vector.extract_strided_slice %38 {offsets = [0, 128], sizes = [2, 128], strides = [1, 1]} : vector<2x256xf32> to vector<2x128xf32>
    %40 = vector.broadcast %8 : vector<1x128xf32> to vector<2x128xf32>
    %41 = arith.addf %39, %40 : vector<2x128xf32>
    %42 = arith.negf %41 : vector<2x128xf32>
    %43 = math.exp %42 : vector<2x128xf32>
    %cst_23 = arith.constant 1.000000e+00 : f32
    %44 = vector.broadcast %cst_23 : f32 to vector<2x128xf32>
    %45 = arith.addf %44, %43 : vector<2x128xf32>
    %46 = arith.divf %44, %45 : vector<2x128xf32>
    %47 = vector.extract_strided_slice %46 {offsets = [0, 0], sizes = [2, 32], strides = [1, 1]} : vector<2x128xf32> to vector<2x32xf32>
    %48 = vector.extract_strided_slice %46 {offsets = [0, 32], sizes = [2, 32], strides = [1, 1]} : vector<2x128xf32> to vector<2x32xf32>
    %49 = vector.extract_strided_slice %46 {offsets = [0, 96], sizes = [2, 32], strides = [1, 1]} : vector<2x128xf32> to vector<2x32xf32>
    %50 = vector.extract_strided_slice %41 {offsets = [0, 64], sizes = [2, 32], strides = [1, 1]} : vector<2x128xf32> to vector<2x32xf32>
    %51 = math.tanh %50 : vector<2x32xf32>
    %52 = arith.mulf %48, %16 : vector<2x32xf32>
    %53 = arith.mulf %47, %51 : vector<2x32xf32>
    %54 = arith.addf %52, %53 : vector<2x32xf32>
    %55 = math.tanh %54 : vector<2x32xf32>
    %56 = arith.mulf %49, %55 : vector<2x32xf32>
    %c0_24 = arith.constant 0 : index
    %c0_25 = arith.constant 0 : index
    %57 = vector.load %arg9[%c0_24, %c0_25] : memref<16x32xf32, #tpu.memory_space<vmem>>, vector<2x32xf32>
    tpu.vector_store %arg9[%c0_24, %c0_25], %56 {strides = array<i32>} : memref<16x32xf32, #tpu.memory_space<vmem>>, vector<2x32xf32>,
    %c1_26 = arith.constant 1 : index
    %c0_27 = arith.constant 0 : index
    %58 = tpu.strided_load %arg8[%c1_26, %c0_27] {strides = array<i32: 8, 1>} : memref<16x128xf32, #tpu.memory_space<vmem>>, vector<2x128xf32>
    %59 = vector.extract_strided_slice %38 {offsets = [0, 0], sizes = [2, 128], strides = [1, 1]} : vector<2x256xf32> to vector<2x128xf32>
    %60 = arith.addf %59, %58 : vector<2x128xf32>
    %61 = arith.negf %60 : vector<2x128xf32>
    %62 = math.exp %61 : vector<2x128xf32>
    %cst_28 = arith.constant 1.000000e+00 : f32
    %63 = vector.broadcast %cst_28 : f32 to vector<2x128xf32>
    %64 = arith.addf %63, %62 : vector<2x128xf32>
    %65 = arith.divf %63, %64 : vector<2x128xf32>
    %66 = vector.extract_strided_slice %65 {offsets = [0, 0], sizes = [2, 32], strides = [1, 1]} : vector<2x128xf32> to vector<2x32xf32>
    %67 = vector.extract_strided_slice %65 {offsets = [0, 32], sizes = [2, 32], strides = [1, 1]} : vector<2x128xf32> to vector<2x32xf32>
    %68 = vector.extract_strided_slice %65 {offsets = [0, 96], sizes = [2, 32], strides = [1, 1]} : vector<2x128xf32> to vector<2x32xf32>
    %69 = vector.extract_strided_slice %60 {offsets = [0, 64], sizes = [2, 32], strides = [1, 1]} : vector<2x128xf32> to vector<2x32xf32>
    %70 = math.tanh %69 : vector<2x32xf32>
    %71 = arith.mulf %67, %34 : vector<2x32xf32>
    %72 = arith.mulf %66, %70 : vector<2x32xf32>
    %73 = arith.addf %71, %72 : vector<2x32xf32>
    %74 = math.tanh %73 : vector<2x32xf32>
    %75 = arith.mulf %68, %74 : vector<2x32xf32>
    %76 = tpu.concatenate %75, %56 in 1 : vector<2x32xf32>, vector<2x32xf32> -> vector<2x64xf32>
    %cst_29 = arith.constant dense<0.000000e+00> : vector<2x256xf32>
    %77 = tpu.matmul %76, %7, %cst_29 {dimension_numbers = #tpu.dot_dimension_numbers<[1], [0], [0], [1], [0, 0, 1, 1], [], []>} : vector<2x64xf32>, vector<64x256xf32>, vector<2x256xf32> -> vector<2x256xf32>
    %78 = vector.extract_strided_slice %77 {offsets = [0, 128], sizes = [2, 128], strides = [1, 1]} : vector<2x256xf32> to vector<2x128xf32>
    %79 = vector.broadcast %8 : vector<1x128xf32> to vector<2x128xf32>
    %80 = arith.addf %78, %79 : vector<2x128xf32>
    %81 = arith.negf %80 : vector<2x128xf32>
    %82 = math.exp %81 : vector<2x128xf32>
    %cst_30 = arith.constant 1.000000e+00 : f32
    %83 = vector.broadcast %cst_30 : f32 to vector<2x128xf32>
    %84 = arith.addf %83, %82 : vector<2x128xf32>
    %85 = arith.divf %83, %84 : vector<2x128xf32>
    %86 = vector.extract_strided_slice %85 {offsets = [0, 0], sizes = [2, 32], strides = [1, 1]} : vector<2x128xf32> to vector<2x32xf32>
    %87 = vector.extract_strided_slice %85 {offsets = [0, 32], sizes = [2, 32], strides = [1, 1]} : vector<2x128xf32> to vector<2x32xf32>
    %88 = vector.extract_strided_slice %85 {offsets = [0, 96], sizes = [2, 32], strides = [1, 1]} : vector<2x128xf32> to vector<2x32xf32>
    %89 = vector.extract_strided_slice %80 {offsets = [0, 64], sizes = [2, 32], strides = [1, 1]} : vector<2x128xf32> to vector<2x32xf32>
    %90 = math.tanh %89 : vector<2x32xf32>
    %91 = arith.mulf %87, %54 : vector<2x32xf32>
    %92 = arith.mulf %86, %90 : vector<2x32xf32>
    %93 = arith.addf %91, %92 : vector<2x32xf32>
    %94 = math.tanh %93 : vector<2x32xf32>
    %95 = arith.mulf %88, %94 : vector<2x32xf32>
    %c2 = arith.constant 2 : index
    %c0_31 = arith.constant 0 : index
    %96 = vector.load %arg9[%c2, %c0_31] : memref<16x32xf32, #tpu.memory_space<vmem>>, vector<2x32xf32>
    tpu.vector_store %arg9[%c2, %c0_31], %95 {strides = array<i32>} : memref<16x32xf32, #tpu.memory_space<vmem>>, vector<2x32xf32>,
    %c2_32 = arith.constant 2 : index
    %c0_33 = arith.constant 0 : index
    %97 = tpu.strided_load %arg8[%c2_32, %c0_33] {strides = array<i32: 8, 1>} : memref<16x128xf32, #tpu.memory_space<vmem>>, vector<2x128xf32>
    %98 = vector.extract_strided_slice %77 {offsets = [0, 0], sizes = [2, 128], strides = [1, 1]} : vector<2x256xf32> to vector<2x128xf32>
    %99 = arith.addf %98, %97 : vector<2x128xf32>
    %100 = arith.negf %99 : vector<2x128xf32>
    %101 = math.exp %100 : vector<2x128xf32>
    %cst_34 = arith.constant 1.000000e+00 : f32
    %102 = vector.broadcast %cst_34 : f32 to vector<2x128xf32>
    %103 = arith.addf %102, %101 : vector<2x128xf32>
    %104 = arith.divf %102, %103 : vector<2x128xf32>
    %105 = vector.extract_strided_slice %104 {offsets = [0, 0], sizes = [2, 32], strides = [1, 1]} : vector<2x128xf32> to vector<2x32xf32>
    %106 = vector.extract_strided_slice %104 {offsets = [0, 32], sizes = [2, 32], strides = [1, 1]} : vector<2x128xf32> to vector<2x32xf32>
    %107 = vector.extract_strided_slice %104 {offsets = [0, 96], sizes = [2, 32], strides = [1, 1]} : vector<2x128xf32> to vector<2x32xf32>
    %108 = vector.extract_strided_slice %99 {offsets = [0, 64], sizes = [2, 32], strides = [1, 1]} : vector<2x128xf32> to vector<2x32xf32>
    %109 = math.tanh %108 : vector<2x32xf32>
    %110 = arith.mulf %106, %73 : vector<2x32xf32>
    %111 = arith.mulf %105, %109 : vector<2x32xf32>
    %112 = arith.addf %110, %111 : vector<2x32xf32>
    %113 = math.tanh %112 : vector<2x32xf32>
    %114 = arith.mulf %107, %113 : vector<2x32xf32>
    %115 = tpu.concatenate %114, %95 in 1 : vector<2x32xf32>, vector<2x32xf32> -> vector<2x64xf32>
    %cst_35 = arith.constant dense<0.000000e+00> : vector<2x256xf32>
    %116 = tpu.matmul %115, %7, %cst_35 {dimension_numbers = #tpu.dot_dimension_numbers<[1], [0], [0], [1], [0, 0, 1, 1], [], []>} : vector<2x64xf32>, vector<64x256xf32>, vector<2x256xf32> -> vector<2x256xf32>
    %117 = vector.extract_strided_slice %116 {offsets = [0, 128], sizes = [2, 128], strides = [1, 1]} : vector<2x256xf32> to vector<2x128xf32>
    %118 = vector.broadcast %8 : vector<1x128xf32> to vector<2x128xf32>
    %119 = arith.addf %117, %118 : vector<2x128xf32>
    %120 = arith.negf %119 : vector<2x128xf32>
    %121 = math.exp %120 : vector<2x128xf32>
    %cst_36 = arith.constant 1.000000e+00 : f32
    %122 = vector.broadcast %cst_36 : f32 to vector<2x128xf32>
    %123 = arith.addf %122, %121 : vector<2x128xf32>
    %124 = arith.divf %122, %123 : vector<2x128xf32>
    %125 = vector.extract_strided_slice %124 {offsets = [0, 0], sizes = [2, 32], strides = [1, 1]} : vector<2x128xf32> to vector<2x32xf32>
    %126 = vector.extract_strided_slice %124 {offsets = [0, 32], sizes = [2, 32], strides = [1, 1]} : vector<2x128xf32> to vector<2x32xf32>
    %127 = vector.extract_strided_slice %124 {offsets = [0, 96], sizes = [2, 32], strides = [1, 1]} : vector<2x128xf32> to vector<2x32xf32>
    %128 = vector.extract_strided_slice %119 {offsets = [0, 64], sizes = [2, 32], strides = [1, 1]} : vector<2x128xf32> to vector<2x32xf32>
    %129 = math.tanh %128 : vector<2x32xf32>
    %130 = arith.mulf %126, %93 : vector<2x32xf32>
    %131 = arith.mulf %125, %129 : vector<2x32xf32>
    %132 = arith.addf %130, %131 : vector<2x32xf32>
    %133 = math.tanh %132 : vector<2x32xf32>
    %134 = arith.mulf %127, %133 : vector<2x32xf32>
    %c4 = arith.constant 4 : index
    %c0_37 = arith.constant 0 : index
    %135 = vector.load %arg9[%c4, %c0_37] : memref<16x32xf32, #tpu.memory_space<vmem>>, vector<2x32xf32>
    tpu.vector_store %arg9[%c4, %c0_37], %134 {strides = array<i32>} : memref<16x32xf32, #tpu.memory_space<vmem>>, vector<2x32xf32>,
    %c3 = arith.constant 3 : index
    %c0_38 = arith.constant 0 : index
    %136 = tpu.strided_load %arg8[%c3, %c0_38] {strides = array<i32: 8, 1>} : memref<16x128xf32, #tpu.memory_space<vmem>>, vector<2x128xf32>
    %137 = vector.extract_strided_slice %116 {offsets = [0, 0], sizes = [2, 128], strides = [1, 1]} : vector<2x256xf32> to vector<2x128xf32>
    %138 = arith.addf %137, %136 : vector<2x128xf32>
    %139 = arith.negf %138 : vector<2x128xf32>
    %140 = math.exp %139 : vector<2x128xf32>
    %cst_39 = arith.constant 1.000000e+00 : f32
    %141 = vector.broadcast %cst_39 : f32 to vector<2x128xf32>
    %142 = arith.addf %141, %140 : vector<2x128xf32>
    %143 = arith.divf %141, %142 : vector<2x128xf32>
    %144 = vector.extract_strided_slice %143 {offsets = [0, 0], sizes = [2, 32], strides = [1, 1]} : vector<2x128xf32> to vector<2x32xf32>
    %145 = vector.extract_strided_slice %143 {offsets = [0, 32], sizes = [2, 32], strides = [1, 1]} : vector<2x128xf32> to vector<2x32xf32>
    %146 = vector.extract_strided_slice %143 {offsets = [0, 96], sizes = [2, 32], strides = [1, 1]} : vector<2x128xf32> to vector<2x32xf32>
    %147 = vector.extract_strided_slice %138 {offsets = [0, 64], sizes = [2, 32], strides = [1, 1]} : vector<2x128xf32> to vector<2x32xf32>
    %148 = math.tanh %147 : vector<2x32xf32>
    %149 = arith.mulf %145, %112 : vector<2x32xf32>
    %150 = arith.mulf %144, %148 : vector<2x32xf32>
    %151 = arith.addf %149, %150 : vector<2x32xf32>
    %152 = math.tanh %151 : vector<2x32xf32>
    %153 = arith.mulf %146, %152 : vector<2x32xf32>
    %154 = tpu.concatenate %153, %134 in 1 : vector<2x32xf32>, vector<2x32xf32> -> vector<2x64xf32>
    %cst_40 = arith.constant dense<0.000000e+00> : vector<2x256xf32>
    %155 = tpu.matmul %154, %7, %cst_40 {dimension_numbers = #tpu.dot_dimension_numbers<[1], [0], [0], [1], [0, 0, 1, 1], [], []>} : vector<2x64xf32>, vector<64x256xf32>, vector<2x256xf32> -> vector<2x256xf32>
    %156 = vector.extract_strided_slice %155 {offsets = [0, 128], sizes = [2, 128], strides = [1, 1]} : vector<2x256xf32> to vector<2x128xf32>
    %157 = vector.broadcast %8 : vector<1x128xf32> to vector<2x128xf32>
    %158 = arith.addf %156, %157 : vector<2x128xf32>
    %159 = arith.negf %158 : vector<2x128xf32>
    %160 = math.exp %159 : vector<2x128xf32>
    %cst_41 = arith.constant 1.000000e+00 : f32
    %161 = vector.broadcast %cst_41 : f32 to vector<2x128xf32>
    %162 = arith.addf %161, %160 : vector<2x128xf32>
    %163 = arith.divf %161, %162 : vector<2x128xf32>
    %164 = vector.extract_strided_slice %163 {offsets = [0, 0], sizes = [2, 32], strides = [1, 1]} : vector<2x128xf32> to vector<2x32xf32>
    %165 = vector.extract_strided_slice %163 {offsets = [0, 32], sizes = [2, 32], strides = [1, 1]} : vector<2x128xf32> to vector<2x32xf32>
    %166 = vector.extract_strided_slice %163 {offsets = [0, 96], sizes = [2, 32], strides = [1, 1]} : vector<2x128xf32> to vector<2x32xf32>
    %167 = vector.extract_strided_slice %158 {offsets = [0, 64], sizes = [2, 32], strides = [1, 1]} : vector<2x128xf32> to vector<2x32xf32>
    %168 = math.tanh %167 : vector<2x32xf32>
    %169 = arith.mulf %165, %132 : vector<2x32xf32>
    %170 = arith.mulf %164, %168 : vector<2x32xf32>
    %171 = arith.addf %169, %170 : vector<2x32xf32>
    %172 = math.tanh %171 : vector<2x32xf32>
    %173 = arith.mulf %166, %172 : vector<2x32xf32>
    %c6 = arith.constant 6 : index
    %c0_42 = arith.constant 0 : index
    %174 = vector.load %arg9[%c6, %c0_42] : memref<16x32xf32, #tpu.memory_space<vmem>>, vector<2x32xf32>
    tpu.vector_store %arg9[%c6, %c0_42], %173 {strides = array<i32>} : memref<16x32xf32, #tpu.memory_space<vmem>>, vector<2x32xf32>,
    %c4_43 = arith.constant 4 : index
    %c0_44 = arith.constant 0 : index
    %175 = tpu.strided_load %arg8[%c4_43, %c0_44] {strides = array<i32: 8, 1>} : memref<16x128xf32, #tpu.memory_space<vmem>>, vector<2x128xf32>
    %176 = vector.extract_strided_slice %155 {offsets = [0, 0], sizes = [2, 128], strides = [1, 1]} : vector<2x256xf32> to vector<2x128xf32>
    %177 = arith.addf %176, %175 : vector<2x128xf32>
    %178 = arith.negf %177 : vector<2x128xf32>
    %179 = math.exp %178 : vector<2x128xf32>
    %cst_45 = arith.constant 1.000000e+00 : f32
    %180 = vector.broadcast %cst_45 : f32 to vector<2x128xf32>
    %181 = arith.addf %180, %179 : vector<2x128xf32>
    %182 = arith.divf %180, %181 : vector<2x128xf32>
    %183 = vector.extract_strided_slice %182 {offsets = [0, 0], sizes = [2, 32], strides = [1, 1]} : vector<2x128xf32> to vector<2x32xf32>
    %184 = vector.extract_strided_slice %182 {offsets = [0, 32], sizes = [2, 32], strides = [1, 1]} : vector<2x128xf32> to vector<2x32xf32>
    %185 = vector.extract_strided_slice %182 {offsets = [0, 96], sizes = [2, 32], strides = [1, 1]} : vector<2x128xf32> to vector<2x32xf32>
    %186 = vector.extract_strided_slice %177 {offsets = [0, 64], sizes = [2, 32], strides = [1, 1]} : vector<2x128xf32> to vector<2x32xf32>
    %187 = math.tanh %186 : vector<2x32xf32>
    %188 = arith.mulf %184, %151 : vector<2x32xf32>
    %189 = arith.mulf %183, %187 : vector<2x32xf32>
    %190 = arith.addf %188, %189 : vector<2x32xf32>
    %191 = math.tanh %190 : vector<2x32xf32>
    %192 = arith.mulf %185, %191 : vector<2x32xf32>
    %193 = tpu.concatenate %192, %173 in 1 : vector<2x32xf32>, vector<2x32xf32> -> vector<2x64xf32>
    %cst_46 = arith.constant dense<0.000000e+00> : vector<2x256xf32>
    %194 = tpu.matmul %193, %7, %cst_46 {dimension_numbers = #tpu.dot_dimension_numbers<[1], [0], [0], [1], [0, 0, 1, 1], [], []>} : vector<2x64xf32>, vector<64x256xf32>, vector<2x256xf32> -> vector<2x256xf32>
    %195 = vector.extract_strided_slice %194 {offsets = [0, 128], sizes = [2, 128], strides = [1, 1]} : vector<2x256xf32> to vector<2x128xf32>
    %196 = vector.broadcast %8 : vector<1x128xf32> to vector<2x128xf32>
    %197 = arith.addf %195, %196 : vector<2x128xf32>
    %198 = arith.negf %197 : vector<2x128xf32>
    %199 = math.exp %198 : vector<2x128xf32>
    %cst_47 = arith.constant 1.000000e+00 : f32
    %200 = vector.broadcast %cst_47 : f32 to vector<2x128xf32>
    %201 = arith.addf %200, %199 : vector<2x128xf32>
    %202 = arith.divf %200, %201 : vector<2x128xf32>
    %203 = vector.extract_strided_slice %202 {offsets = [0, 0], sizes = [2, 32], strides = [1, 1]} : vector<2x128xf32> to vector<2x32xf32>
    %204 = vector.extract_strided_slice %202 {offsets = [0, 32], sizes = [2, 32], strides = [1, 1]} : vector<2x128xf32> to vector<2x32xf32>
    %205 = vector.extract_strided_slice %202 {offsets = [0, 96], sizes = [2, 32], strides = [1, 1]} : vector<2x128xf32> to vector<2x32xf32>
    %206 = vector.extract_strided_slice %197 {offsets = [0, 64], sizes = [2, 32], strides = [1, 1]} : vector<2x128xf32> to vector<2x32xf32>
    %207 = math.tanh %206 : vector<2x32xf32>
    %208 = arith.mulf %204, %171 : vector<2x32xf32>
    %209 = arith.mulf %203, %207 : vector<2x32xf32>
    %210 = arith.addf %208, %209 : vector<2x32xf32>
    %211 = math.tanh %210 : vector<2x32xf32>
    %212 = arith.mulf %205, %211 : vector<2x32xf32>
    %c8 = arith.constant 8 : index
    %c0_48 = arith.constant 0 : index
    %213 = vector.load %arg9[%c8, %c0_48] : memref<16x32xf32, #tpu.memory_space<vmem>>, vector<2x32xf32>
    tpu.vector_store %arg9[%c8, %c0_48], %212 {strides = array<i32>} : memref<16x32xf32, #tpu.memory_space<vmem>>, vector<2x32xf32>,
    %c5 = arith.constant 5 : index
    %c0_49 = arith.constant 0 : index
    %214 = tpu.strided_load %arg8[%c5, %c0_49] {strides = array<i32: 8, 1>} : memref<16x128xf32, #tpu.memory_space<vmem>>, vector<2x128xf32>
    %215 = vector.extract_strided_slice %194 {offsets = [0, 0], sizes = [2, 128], strides = [1, 1]} : vector<2x256xf32> to vector<2x128xf32>
    %216 = arith.addf %215, %214 : vector<2x128xf32>
    %217 = arith.negf %216 : vector<2x128xf32>
    %218 = math.exp %217 : vector<2x128xf32>
    %cst_50 = arith.constant 1.000000e+00 : f32
    %219 = vector.broadcast %cst_50 : f32 to vector<2x128xf32>
    %220 = arith.addf %219, %218 : vector<2x128xf32>
    %221 = arith.divf %219, %220 : vector<2x128xf32>
    %222 = vector.extract_strided_slice %221 {offsets = [0, 0], sizes = [2, 32], strides = [1, 1]} : vector<2x128xf32> to vector<2x32xf32>
    %223 = vector.extract_strided_slice %221 {offsets = [0, 32], sizes = [2, 32], strides = [1, 1]} : vector<2x128xf32> to vector<2x32xf32>
    %224 = vector.extract_strided_slice %221 {offsets = [0, 96], sizes = [2, 32], strides = [1, 1]} : vector<2x128xf32> to vector<2x32xf32>
    %225 = vector.extract_strided_slice %216 {offsets = [0, 64], sizes = [2, 32], strides = [1, 1]} : vector<2x128xf32> to vector<2x32xf32>
    %226 = math.tanh %225 : vector<2x32xf32>
    %227 = arith.mulf %223, %190 : vector<2x32xf32>
    %228 = arith.mulf %222, %226 : vector<2x32xf32>
    %229 = arith.addf %227, %228 : vector<2x32xf32>
    %230 = math.tanh %229 : vector<2x32xf32>
    %231 = arith.mulf %224, %230 : vector<2x32xf32>
    %232 = tpu.concatenate %231, %212 in 1 : vector<2x32xf32>, vector<2x32xf32> -> vector<2x64xf32>
    %cst_51 = arith.constant dense<0.000000e+00> : vector<2x256xf32>
    %233 = tpu.matmul %232, %7, %cst_51 {dimension_numbers = #tpu.dot_dimension_numbers<[1], [0], [0], [1], [0, 0, 1, 1], [], []>} : vector<2x64xf32>, vector<64x256xf32>, vector<2x256xf32> -> vector<2x256xf32>
    %234 = vector.extract_strided_slice %233 {offsets = [0, 128], sizes = [2, 128], strides = [1, 1]} : vector<2x256xf32> to vector<2x128xf32>
    %235 = vector.broadcast %8 : vector<1x128xf32> to vector<2x128xf32>
    %236 = arith.addf %234, %235 : vector<2x128xf32>
    %237 = arith.negf %236 : vector<2x128xf32>
    %238 = math.exp %237 : vector<2x128xf32>
    %cst_52 = arith.constant 1.000000e+00 : f32
    %239 = vector.broadcast %cst_52 : f32 to vector<2x128xf32>
    %240 = arith.addf %239, %238 : vector<2x128xf32>
    %241 = arith.divf %239, %240 : vector<2x128xf32>
    %242 = vector.extract_strided_slice %241 {offsets = [0, 0], sizes = [2, 32], strides = [1, 1]} : vector<2x128xf32> to vector<2x32xf32>
    %243 = vector.extract_strided_slice %241 {offsets = [0, 32], sizes = [2, 32], strides = [1, 1]} : vector<2x128xf32> to vector<2x32xf32>
    %244 = vector.extract_strided_slice %241 {offsets = [0, 96], sizes = [2, 32], strides = [1, 1]} : vector<2x128xf32> to vector<2x32xf32>
    %245 = vector.extract_strided_slice %236 {offsets = [0, 64], sizes = [2, 32], strides = [1, 1]} : vector<2x128xf32> to vector<2x32xf32>
    %246 = math.tanh %245 : vector<2x32xf32>
    %247 = arith.mulf %243, %210 : vector<2x32xf32>
    %248 = arith.mulf %242, %246 : vector<2x32xf32>
    %249 = arith.addf %247, %248 : vector<2x32xf32>
    %250 = math.tanh %249 : vector<2x32xf32>
    %251 = arith.mulf %244, %250 : vector<2x32xf32>
    %c10 = arith.constant 10 : index
    %c0_53 = arith.constant 0 : index
    %252 = vector.load %arg9[%c10, %c0_53] : memref<16x32xf32, #tpu.memory_space<vmem>>, vector<2x32xf32>
    tpu.vector_store %arg9[%c10, %c0_53], %251 {strides = array<i32>} : memref<16x32xf32, #tpu.memory_space<vmem>>, vector<2x32xf32>,
    %c6_54 = arith.constant 6 : index
    %c0_55 = arith.constant 0 : index
    %253 = tpu.strided_load %arg8[%c6_54, %c0_55] {strides = array<i32: 8, 1>} : memref<16x128xf32, #tpu.memory_space<vmem>>, vector<2x128xf32>
    %254 = vector.extract_strided_slice %233 {offsets = [0, 0], sizes = [2, 128], strides = [1, 1]} : vector<2x256xf32> to vector<2x128xf32>
    %255 = arith.addf %254, %253 : vector<2x128xf32>
    %256 = arith.negf %255 : vector<2x128xf32>
    %257 = math.exp %256 : vector<2x128xf32>
    %cst_56 = arith.constant 1.000000e+00 : f32
    %258 = vector.broadcast %cst_56 : f32 to vector<2x128xf32>
    %259 = arith.addf %258, %257 : vector<2x128xf32>
    %260 = arith.divf %258, %259 : vector<2x128xf32>
    %261 = vector.extract_strided_slice %260 {offsets = [0, 0], sizes = [2, 32], strides = [1, 1]} : vector<2x128xf32> to vector<2x32xf32>
    %262 = vector.extract_strided_slice %260 {offsets = [0, 32], sizes = [2, 32], strides = [1, 1]} : vector<2x128xf32> to vector<2x32xf32>
    %263 = vector.extract_strided_slice %260 {offsets = [0, 96], sizes = [2, 32], strides = [1, 1]} : vector<2x128xf32> to vector<2x32xf32>
    %264 = vector.extract_strided_slice %255 {offsets = [0, 64], sizes = [2, 32], strides = [1, 1]} : vector<2x128xf32> to vector<2x32xf32>
    %265 = math.tanh %264 : vector<2x32xf32>
    %266 = arith.mulf %262, %229 : vector<2x32xf32>
    %267 = arith.mulf %261, %265 : vector<2x32xf32>
    %268 = arith.addf %266, %267 : vector<2x32xf32>
    %269 = math.tanh %268 : vector<2x32xf32>
    %270 = arith.mulf %263, %269 : vector<2x32xf32>
    %271 = tpu.concatenate %270, %251 in 1 : vector<2x32xf32>, vector<2x32xf32> -> vector<2x64xf32>
    %cst_57 = arith.constant dense<0.000000e+00> : vector<2x256xf32>
    %272 = tpu.matmul %271, %7, %cst_57 {dimension_numbers = #tpu.dot_dimension_numbers<[1], [0], [0], [1], [0, 0, 1, 1], [], []>} : vector<2x64xf32>, vector<64x256xf32>, vector<2x256xf32> -> vector<2x256xf32>
    %273 = vector.extract_strided_slice %272 {offsets = [0, 128], sizes = [2, 128], strides = [1, 1]} : vector<2x256xf32> to vector<2x128xf32>
    %274 = vector.broadcast %8 : vector<1x128xf32> to vector<2x128xf32>
    %275 = arith.addf %273, %274 : vector<2x128xf32>
    %276 = arith.negf %275 : vector<2x128xf32>
    %277 = math.exp %276 : vector<2x128xf32>
    %cst_58 = arith.constant 1.000000e+00 : f32
    %278 = vector.broadcast %cst_58 : f32 to vector<2x128xf32>
    %279 = arith.addf %278, %277 : vector<2x128xf32>
    %280 = arith.divf %278, %279 : vector<2x128xf32>
    %281 = vector.extract_strided_slice %280 {offsets = [0, 0], sizes = [2, 32], strides = [1, 1]} : vector<2x128xf32> to vector<2x32xf32>
    %282 = vector.extract_strided_slice %280 {offsets = [0, 32], sizes = [2, 32], strides = [1, 1]} : vector<2x128xf32> to vector<2x32xf32>
    %283 = vector.extract_strided_slice %280 {offsets = [0, 96], sizes = [2, 32], strides = [1, 1]} : vector<2x128xf32> to vector<2x32xf32>
    %284 = vector.extract_strided_slice %275 {offsets = [0, 64], sizes = [2, 32], strides = [1, 1]} : vector<2x128xf32> to vector<2x32xf32>
    %285 = math.tanh %284 : vector<2x32xf32>
    %286 = arith.mulf %282, %249 : vector<2x32xf32>
    %287 = arith.mulf %281, %285 : vector<2x32xf32>
    %288 = arith.addf %286, %287 : vector<2x32xf32>
    %289 = math.tanh %288 : vector<2x32xf32>
    %290 = arith.mulf %283, %289 : vector<2x32xf32>
    %c12 = arith.constant 12 : index
    %c0_59 = arith.constant 0 : index
    %291 = vector.load %arg9[%c12, %c0_59] : memref<16x32xf32, #tpu.memory_space<vmem>>, vector<2x32xf32>
    tpu.vector_store %arg9[%c12, %c0_59], %290 {strides = array<i32>} : memref<16x32xf32, #tpu.memory_space<vmem>>, vector<2x32xf32>,
    %c7 = arith.constant 7 : index
    %c0_60 = arith.constant 0 : index
    %292 = tpu.strided_load %arg8[%c7, %c0_60] {strides = array<i32: 8, 1>} : memref<16x128xf32, #tpu.memory_space<vmem>>, vector<2x128xf32>
    %293 = vector.extract_strided_slice %272 {offsets = [0, 0], sizes = [2, 128], strides = [1, 1]} : vector<2x256xf32> to vector<2x128xf32>
    %294 = arith.addf %293, %292 : vector<2x128xf32>
    %295 = arith.negf %294 : vector<2x128xf32>
    %296 = math.exp %295 : vector<2x128xf32>
    %cst_61 = arith.constant 1.000000e+00 : f32
    %297 = vector.broadcast %cst_61 : f32 to vector<2x128xf32>
    %298 = arith.addf %297, %296 : vector<2x128xf32>
    %299 = arith.divf %297, %298 : vector<2x128xf32>
    %300 = vector.extract_strided_slice %299 {offsets = [0, 0], sizes = [2, 32], strides = [1, 1]} : vector<2x128xf32> to vector<2x32xf32>
    %301 = vector.extract_strided_slice %299 {offsets = [0, 32], sizes = [2, 32], strides = [1, 1]} : vector<2x128xf32> to vector<2x32xf32>
    %302 = vector.extract_strided_slice %299 {offsets = [0, 96], sizes = [2, 32], strides = [1, 1]} : vector<2x128xf32> to vector<2x32xf32>
    %303 = vector.extract_strided_slice %294 {offsets = [0, 64], sizes = [2, 32], strides = [1, 1]} : vector<2x128xf32> to vector<2x32xf32>
    %304 = math.tanh %303 : vector<2x32xf32>
    %305 = arith.mulf %301, %268 : vector<2x32xf32>
    %306 = arith.mulf %300, %304 : vector<2x32xf32>
    %307 = arith.addf %305, %306 : vector<2x32xf32>
    %308 = math.tanh %307 : vector<2x32xf32>
    %309 = arith.mulf %302, %308 : vector<2x32xf32>
    %310 = tpu.concatenate %309, %290 in 1 : vector<2x32xf32>, vector<2x32xf32> -> vector<2x64xf32>
    %cst_62 = arith.constant dense<0.000000e+00> : vector<2x256xf32>
    %311 = tpu.matmul %310, %7, %cst_62 {dimension_numbers = #tpu.dot_dimension_numbers<[1], [0], [0], [1], [0, 0, 1, 1], [], []>} : vector<2x64xf32>, vector<64x256xf32>, vector<2x256xf32> -> vector<2x256xf32>
    %312 = vector.extract_strided_slice %311 {offsets = [0, 128], sizes = [2, 128], strides = [1, 1]} : vector<2x256xf32> to vector<2x128xf32>
    %313 = vector.broadcast %8 : vector<1x128xf32> to vector<2x128xf32>
    %314 = arith.addf %312, %313 : vector<2x128xf32>
    %315 = arith.negf %314 : vector<2x128xf32>
    %316 = math.exp %315 : vector<2x128xf32>
    %cst_63 = arith.constant 1.000000e+00 : f32
    %317 = vector.broadcast %cst_63 : f32 to vector<2x128xf32>
    %318 = arith.addf %317, %316 : vector<2x128xf32>
    %319 = arith.divf %317, %318 : vector<2x128xf32>
    %320 = vector.extract_strided_slice %319 {offsets = [0, 0], sizes = [2, 32], strides = [1, 1]} : vector<2x128xf32> to vector<2x32xf32>
    %321 = vector.extract_strided_slice %319 {offsets = [0, 32], sizes = [2, 32], strides = [1, 1]} : vector<2x128xf32> to vector<2x32xf32>
    %322 = vector.extract_strided_slice %319 {offsets = [0, 96], sizes = [2, 32], strides = [1, 1]} : vector<2x128xf32> to vector<2x32xf32>
    %323 = vector.extract_strided_slice %314 {offsets = [0, 64], sizes = [2, 32], strides = [1, 1]} : vector<2x128xf32> to vector<2x32xf32>
    %324 = math.tanh %323 : vector<2x32xf32>
    %325 = arith.mulf %321, %288 : vector<2x32xf32>
    %326 = arith.mulf %320, %324 : vector<2x32xf32>
    %327 = arith.addf %325, %326 : vector<2x32xf32>
    %328 = math.tanh %327 : vector<2x32xf32>
    %329 = arith.mulf %322, %328 : vector<2x32xf32>
    %c14 = arith.constant 14 : index
    %c0_64 = arith.constant 0 : index
    %330 = vector.load %arg9[%c14, %c0_64] : memref<16x32xf32, #tpu.memory_space<vmem>>, vector<2x32xf32>
    tpu.vector_store %arg9[%c14, %c0_64], %329 {strides = array<i32>} : memref<16x32xf32, #tpu.memory_space<vmem>>, vector<2x32xf32>,
    %c0_65 = arith.constant 0 : index
    %c0_66 = arith.constant 0 : index
    %c0_67 = arith.constant 0 : index
    %331 = vector.load %arg6[%c0_65, %c0_66, %c0_67] : memref<2x2x32xf32, #tpu.memory_space<vmem>>, vector<1x2x32xf32>
    %332 = vector.shape_cast %331 : vector<1x2x32xf32> to vector<2x32xf32>
    %333 = vector.shape_cast %309 : vector<2x32xf32> to vector<1x2x32xf32>
    tpu.vector_store %arg6[%c0_65, %c0_66, %c0_67], %333 {strides = array<i32>} : memref<2x2x32xf32, #tpu.memory_space<vmem>>, vector<1x2x32xf32>,
    %c1_68 = arith.constant 1 : index
    %c0_69 = arith.constant 0 : index
    %c0_70 = arith.constant 0 : index
    %334 = vector.load %arg6[%c1_68, %c0_69, %c0_70] : memref<2x2x32xf32, #tpu.memory_space<vmem>>, vector<1x2x32xf32>
    %335 = vector.shape_cast %334 : vector<1x2x32xf32> to vector<2x32xf32>
    %336 = vector.shape_cast %329 : vector<2x32xf32> to vector<1x2x32xf32>
    tpu.vector_store %arg6[%c1_68, %c0_69, %c0_70], %336 {strides = array<i32>} : memref<2x2x32xf32, #tpu.memory_space<vmem>>, vector<1x2x32xf32>,
    %c0_71 = arith.constant 0 : index
    %c0_72 = arith.constant 0 : index
    %c0_73 = arith.constant 0 : index
    %337 = vector.load %arg7[%c0_71, %c0_72, %c0_73] : memref<2x2x32xf32, #tpu.memory_space<vmem>>, vector<1x2x32xf32>
    %338 = vector.shape_cast %337 : vector<1x2x32xf32> to vector<2x32xf32>
    %339 = vector.shape_cast %307 : vector<2x32xf32> to vector<1x2x32xf32>
    tpu.vector_store %arg7[%c0_71, %c0_72, %c0_73], %339 {strides = array<i32>} : memref<2x2x32xf32, #tpu.memory_space<vmem>>, vector<1x2x32xf32>,
    %c1_74 = arith.constant 1 : index
    %c0_75 = arith.constant 0 : index
    %c0_76 = arith.constant 0 : index
    %340 = vector.load %arg7[%c1_74, %c0_75, %c0_76] : memref<2x2x32xf32, #tpu.memory_space<vmem>>, vector<1x2x32xf32>
    %341 = vector.shape_cast %340 : vector<1x2x32xf32> to vector<2x32xf32>
    %342 = vector.shape_cast %327 : vector<2x32xf32> to vector<1x2x32xf32>
    tpu.vector_store %arg7[%c1_74, %c0_75, %c0_76], %342 {strides = array<i32>} : memref<2x2x32xf32, #tpu.memory_space<vmem>>, vector<1x2x32xf32>,
    %c0_77 = arith.constant 0 : index
    %c0_78 = arith.constant 0 : index
    %343 = vector.load %arg9[%c0_77, %c0_78] : memref<16x32xf32, #tpu.memory_space<vmem>>, vector<16x32xf32>
    %c0_79 = arith.constant 0 : index
    %c0_80 = arith.constant 0 : index
    %344 = vector.load %arg4[%c0_79, %c0_80] : memref<33x768xf32, #tpu.memory_space<vmem>>, vector<32x32xf32>
    %cst_81 = arith.constant dense<0.000000e+00> : vector<16x32xf32>
    %345 = tpu.matmul %343, %344, %cst_81 {dimension_numbers = #tpu.dot_dimension_numbers<[1], [0], [0], [1], [0, 0, 1, 1], [], []>} : vector<16x32xf32>, vector<32x32xf32>, vector<16x32xf32> -> vector<16x32xf32>
    %c32_82 = arith.constant 32 : index
    %c0_83 = arith.constant 0 : index
    %346 = vector.load %arg4[%c32_82, %c0_83] : memref<33x768xf32, #tpu.memory_space<vmem>>, vector<1x32xf32>
    %347 = vector.broadcast %346 : vector<1x32xf32> to vector<16x32xf32>
    %348 = arith.addf %345, %347 : vector<16x32xf32>
    %cst_84 = arith.constant 0.000000e+00 : f32
    %349 = vector.broadcast %cst_84 : f32 to vector<16x32xf32>
    %350 = arith.cmpf ogt, %348, %349 : vector<16x32xf32>
    %cst_85 = arith.constant 0.00999999977 : f32
    %351 = vector.broadcast %cst_85 : f32 to vector<16x32xf32>
    %352 = arith.mulf %351, %348 : vector<16x32xf32>
    %353 = arith.select %350, %348, %352 : vector<16x32xi1>, vector<16x32xf32>
    %c0_86 = arith.constant 0 : index
    %c128_87 = arith.constant 128 : index
    %354 = vector.load %arg4[%c0_86, %c128_87] : memref<33x768xf32, #tpu.memory_space<vmem>>, vector<32x96xf32>
    %cst_88 = arith.constant dense<0.000000e+00> : vector<16x96xf32>
    %355 = tpu.matmul %353, %354, %cst_88 {dimension_numbers = #tpu.dot_dimension_numbers<[1], [0], [0], [1], [0, 0, 1, 1], [], []>} : vector<16x32xf32>, vector<32x96xf32>, vector<16x96xf32> -> vector<16x96xf32>
    %c32_89 = arith.constant 32 : index
    %c128_90 = arith.constant 128 : index
    %356 = vector.load %arg4[%c32_89, %c128_90] : memref<33x768xf32, #tpu.memory_space<vmem>>, vector<1x96xf32>
    %357 = vector.broadcast %356 : vector<1x96xf32> to vector<16x96xf32>
    %358 = arith.addf %355, %357 : vector<16x96xf32>
    %359 = vector.extract_strided_slice %358 {offsets = [0, 0], sizes = [16, 32], strides = [1, 1]} : vector<16x96xf32> to vector<16x32xf32>
    %360 = vector.extract_strided_slice %358 {offsets = [0, 32], sizes = [16, 32], strides = [1, 1]} : vector<16x96xf32> to vector<16x32xf32>
    %361 = vector.extract_strided_slice %358 {offsets = [0, 64], sizes = [16, 32], strides = [1, 1]} : vector<16x96xf32> to vector<16x32xf32>
    "tpu.trace_start"() <{level = 10 : i32, message = "nd,md->nm"}> : () -> ()
    %cst_91 = arith.constant dense<0.000000e+00> : vector<16x16xf32>
    %362 = tpu.matmul %359, %360, %cst_91 {dimension_numbers = #tpu.dot_dimension_numbers<[1], [1], [0], [0], [0, 0, 1, 0], [], []>} : vector<16x32xf32>, vector<16x32xf32>, vector<16x16xf32> -> vector<16x16xf32>
    "tpu.trace_stop"() : () -> ()
    %cst_92 = arith.constant 0.176776692 : f32
    %363 = vector.broadcast %cst_92 : f32 to vector<16x16xf32>
    %364 = arith.mulf %362, %363 : vector<16x16xf32>
    %c0_93 = arith.constant 0 : index
    %c640 = arith.constant 640 : index
    %365 = vector.load %arg4[%c0_93, %c640] : memref<33x768xf32, #tpu.memory_space<vmem>>, vector<16x16xf32>
    %366 = arith.addf %364, %365 : vector<16x16xf32>
    %cst_94 = arith.constant dense<0xFF800000> : vector<16xf32>
    %367 = vector.multi_reduction <maximumf>, %366, %cst_94 [1] : vector<16x16xf32> to vector<16xf32>
    %368 = vector.shape_cast %367 : vector<16xf32> to vector<16x1xf32>
    %369 = vector.broadcast %368 : vector<16x1xf32> to vector<16x16xf32>
    %370 = arith.subf %366, %369 : vector<16x16xf32>
    %371 = math.exp %370 : vector<16x16xf32>
    %cst_95 = arith.constant dense<0.000000e+00> : vector<16xf32>
    %372 = vector.multi_reduction <add>, %371, %cst_95 [1] : vector<16x16xf32> to vector<16xf32>
    %373 = vector.shape_cast %372 : vector<16xf32> to vector<16x1xf32>
    %374 = tpu.reciprocal %373 {approx = true} : vector<16x1xf32> -> vector<16x1xf32>
    %375 = arith.mulf %373, %374 : vector<16x1xf32>
    %cst_96 = arith.constant 2.000000e+00 : f32
    %376 = vector.broadcast %cst_96 : f32 to vector<16x1xf32>
    %377 = arith.subf %376, %375 : vector<16x1xf32>
    %378 = arith.mulf %374, %377 : vector<16x1xf32>
    %379 = vector.broadcast %378 : vector<16x1xf32> to vector<16x16xf32>
    %380 = arith.mulf %371, %379 : vector<16x16xf32>
    %cst_97 = arith.constant dense<0.000000e+00> : vector<16x32xf32>
    %381 = tpu.matmul %380, %361, %cst_97 {dimension_numbers = #tpu.dot_dimension_numbers<[1], [0], [0], [1], [0, 0, 1, 1], [], []>} : vector<16x16xf32>, vector<16x32xf32>, vector<16x32xf32> -> vector<16x32xf32>
    %c0_98 = arith.constant 0 : index
    %c256 = arith.constant 256 : index
    %382 = vector.load %arg4[%c0_98, %c256] : memref<33x768xf32, #tpu.memory_space<vmem>>, vector<32x64xf32>
    %cst_99 = arith.constant dense<0.000000e+00> : vector<16x64xf32>
    %383 = tpu.matmul %381, %382, %cst_99 {dimension_numbers = #tpu.dot_dimension_numbers<[1], [0], [0], [1], [0, 0, 1, 1], [], []>} : vector<16x32xf32>, vector<32x64xf32>, vector<16x64xf32> -> vector<16x64xf32>
    %c32_100 = arith.constant 32 : index
    %c256_101 = arith.constant 256 : index
    %384 = vector.load %arg4[%c32_100, %c256_101] : memref<33x768xf32, #tpu.memory_space<vmem>>, vector<1x64xf32>
    %385 = vector.broadcast %384 : vector<1x64xf32> to vector<16x64xf32>
    %386 = arith.addf %383, %385 : vector<16x64xf32>
    %cst_102 = arith.constant 0.000000e+00 : f32
    %387 = vector.broadcast %cst_102 : f32 to vector<16x64xf32>
    %388 = arith.maximumf %386, %387 : vector<16x64xf32>
    %c0_103 = arith.constant 0 : index
    %c256_104 = arith.constant 256 : index
    %389 = vector.load %arg3[%c0_103, %c256_104] : memref<65x384xf32, #tpu.memory_space<vmem>>, vector<64x32xf32>
    %cst_105 = arith.constant dense<0.000000e+00> : vector<16x32xf32>
    %390 = tpu.matmul %388, %389, %cst_105 {dimension_numbers = #tpu.dot_dimension_numbers<[1], [0], [0], [1], [0, 0, 1, 1], [], []>} : vector<16x64xf32>, vector<64x32xf32>, vector<16x32xf32> -> vector<16x32xf32>
    %c64_106 = arith.constant 64 : index
    %c256_107 = arith.constant 256 : index
    %391 = vector.load %arg3[%c64_106, %c256_107] : memref<65x384xf32, #tpu.memory_space<vmem>>, vector<1x32xf32>
    %392 = vector.broadcast %391 : vector<1x32xf32> to vector<16x32xf32>
    %393 = arith.addf %390, %392 : vector<16x32xf32>
    %cst_108 = arith.constant 0.000000e+00 : f32
    %394 = vector.broadcast %cst_108 : f32 to vector<16x32xf32>
    %395 = arith.maximumf %393, %394 : vector<16x32xf32>
    %c0_109 = arith.constant 0 : index
    %c384 = arith.constant 384 : index
    %396 = vector.load %arg4[%c0_109, %c384] : memref<33x768xf32, #tpu.memory_space<vmem>>, vector<32x4xf32>
    %cst_110 = arith.constant dense<0.000000e+00> : vector<16x4xf32>
    %397 = tpu.matmul %395, %396, %cst_110 {dimension_numbers = #tpu.dot_dimension_numbers<[1], [0], [0], [1], [0, 0, 1, 1], [], []>} : vector<16x32xf32>, vector<32x4xf32>, vector<16x4xf32> -> vector<16x4xf32>
    %c32_111 = arith.constant 32 : index
    %c384_112 = arith.constant 384 : index
    %398 = vector.load %arg4[%c32_111, %c384_112] : memref<33x768xf32, #tpu.memory_space<vmem>>, vector<1x4xf32>
    %399 = vector.broadcast %398 : vector<1x4xf32> to vector<16x4xf32>
    %400 = arith.addf %397, %399 : vector<16x4xf32>
    %cst_113 = arith.constant 0.000000e+00 : f32
    %401 = vector.broadcast %cst_113 : f32 to vector<16x4xf32>
    %402 = arith.maximumf %400, %401 : vector<16x4xf32>
    %c0_114 = arith.constant 0 : index
    %c0_115 = arith.constant 0 : index
    %403 = vector.load %arg10[%c0_114, %c0_115] : memref<16x4xf32, #tpu.memory_space<vmem>>, vector<16x4xf32>
    tpu.vector_store %arg10[%c0_114, %c0_115], %402 {strides = array<i32>} : memref<16x4xf32, #tpu.memory_space<vmem>>, vector<16x4xf32>,
    %c0_116 = arith.constant 0 : index
    %c0_117 = arith.constant 0 : index
    %404 = tpu.strided_load %arg10[%c0_116, %c0_117] {strides = array<i32: 2, 1>} : memref<16x4xf32, #tpu.memory_space<vmem>>, vector<8x4xf32>
    %c0_118 = arith.constant 0 : index
    %c0_119 = arith.constant 0 : index
    %c0_120 = arith.constant 0 : index
    %405 = vector.load %arg5[%c0_118, %c0_119, %c0_120] : memref<2x8x4xf32, #tpu.memory_space<vmem>>, vector<1x8x4xf32>
    %406 = vector.shape_cast %405 : vector<1x8x4xf32> to vector<8x4xf32>
    %407 = vector.shape_cast %404 : vector<8x4xf32> to vector<1x8x4xf32>
    tpu.vector_store %arg5[%c0_118, %c0_119, %c0_120], %407 {strides = array<i32>} : memref<2x8x4xf32, #tpu.memory_space<vmem>>, vector<1x8x4xf32>,
    %c1_121 = arith.constant 1 : index
    %c0_122 = arith.constant 0 : index
    %408 = tpu.strided_load %arg10[%c1_121, %c0_122] {strides = array<i32: 2, 1>} : memref<16x4xf32, #tpu.memory_space<vmem>>, vector<8x4xf32>
    %c1_123 = arith.constant 1 : index
    %c0_124 = arith.constant 0 : index
    %c0_125 = arith.constant 0 : index
    %409 = vector.load %arg5[%c1_123, %c0_124, %c0_125] : memref<2x8x4xf32, #tpu.memory_space<vmem>>, vector<1x8x4xf32>
    %410 = vector.shape_cast %409 : vector<1x8x4xf32> to vector<8x4xf32>
    %411 = vector.shape_cast %408 : vector<8x4xf32> to vector<1x8x4xf32>
    tpu.vector_store %arg5[%c1_123, %c0_124, %c0_125], %411 {strides = array<i32>} : memref<2x8x4xf32, #tpu.memory_space<vmem>>, vector<1x8x4xf32>,
    return
  }
}

</mosaic_0001>

<bundles_post_ra>
// kernel: _forward_impl.1
= control target key start
LH: loop header
LB: loop body
LE: loop exit
PB: predicated region body
PF: predicated region fallthrough
CT: control target
= control target key end

     0   :  { %13 = vsyncpa [#allocation6], 0  ;;  %s3118_s0 = inlined_call_operand.vmem [shape: f32[16,4], index: 0, kind: input, shape index: {}]   ;;  %s3119_s1 = inlined_call_operand.vmem [shape: f32[2,2,32], index: 1, kind: input, shape index: {}]   ;;  %s3120_s2 = inlined_call_operand.vmem [shape: f32[2,2,32], index: 2, kind: input, shape index: {}]   ;;  %s3121_s3 = inlined_call_operand.hbm [shape: f32[65,384], index: 3, kind: input, shape index: {}]   ;;  %s3122_s4 = inlined_call_operand.hbm [shape: f32[33,768], index: 4, kind: input, shape index: {}]   ;;  %s3123_s5 = inlined_call_operand.vmem [shape: f32[2,8,4], index: 5, kind: output, shape index: {0}]   ;;  %s3124_s6 = inlined_call_operand.hbm [shape: f32[2,2,32], index: 6, kind: output, shape index: {1}]   ;;  %s3125_s7 = inlined_call_operand.hbm [shape: f32[2,2,32], index: 7, kind: output, shape index: {2}]  }
   0x1   :  { %14 = vsyncpa [#allocation9], 0 }
   0x2   :  { %15 = vsyncpa [#allocation7], 0 }
   0x3   :  { %16 = vsyncpa [#allocation12], 0  ;;  %s2714_s24 = smov [#allocation5]   ;;  %s2618_s28 = scalar_lea.hbm %s3121_s3, 3456 }
   0x4   :  { %s28_s25 = sshll.u32 %s2714_s24, 4  ;;  %p2619_p0 = scmp.ne.s32.totalorder %s3121_s3, %s2618_s28  ;;  %s29_s25 = int_to_ptr.vmem [resolvable:$true] %s28_s25 }
   0x5   :  { %p2622_p1 = scmp.lt.u32.totalorder %s2618_s28, %s3121_s3 }
   0x7   :  { %p2624_p2 = pnand %p2622_p1, %p2619_p0 }
   0x9   :  { %2627 = shalt.err (!%p2624_p2)
}
   0xa   :  { %s2628_s10 = scalar_lea.vmem %s29_s25, 3456  ;;  %p2633_p4 = scmp.lt.s32.totalorder %s29_s25, %s29_s25 }
   0xb   :  { %p2629_p3 = scmp.ne.s32.totalorder %s29_s25, %s2628_s10  ;;  %p2634_p5 = scmp.lt.s32.totalorder %s2628_s10, %s2628_s10 }
   0xd   :  { %p2635_p6 = por %p2634_p5, %p2633_p4 }
   0xf   :  { %p2636_p7 = pnand %p2635_p6, %p2629_p3 }
  0x11   :  { %2639 = shalt.err (!%p2636_p7)
}
  0x12   :  { %s2715_s11 = smov 384   ;;  %s2716_s12 = smov 24  }
  0x13   :  { %34 = dma.hbm_to_vmem [thread:$0]  %s3121_s3, 3456, %s29_s25, [#allocation6], %s2715_s11, %s2715_s11, %s2716_s12  }
  0x14   :  { %s2717_s15 = smov [#allocation8]   ;;  %s2640_s19 = scalar_lea.hbm %s3122_s4, 3840 }
  0x15   :  { %s40_s16 = sshll.u32 %s2717_s15, 4  ;;  %p2641_p8 = scmp.ne.s32.totalorder %s3122_s4, %s2640_s19  ;;  %s41_s16 = int_to_ptr.vmem [resolvable:$true] %s40_s16 }
  0x16   :  { %p2644_p9 = scmp.lt.u32.totalorder %s2640_s19, %s3122_s4 }
  0x18   :  { %p2646_p10 = pnand %p2644_p9, %p2641_p8 }
  0x1a   :  { %2649 = shalt.err (!%p2646_p10)
}
  0x1b   :  { %s2650_s24 = scalar_lea.vmem %s41_s16, 3840  ;;  %p2655_p12 = scmp.lt.s32.totalorder %s41_s16, %s41_s16 }
  0x1c   :  { %p2651_p11 = scmp.ne.s32.totalorder %s41_s16, %s2650_s24  ;;  %p2656_p13 = scmp.lt.s32.totalorder %s2650_s24, %s2650_s24 }
  0x1e   :  { %p2657_p0 = por %p2656_p13, %p2655_p12 }
  0x20   :  { %p2658_p1 = pnand %p2657_p0, %p2651_p11 }
  0x22   :  { %2661 = shalt.err (!%p2658_p1)
}
  0x23   :  { %s2718_s3 = smov 768   ;;  %s2719_s25 = smov 48  }
  0x24   :  { %46 = dma.hbm_to_vmem [thread:$0]  %s3122_s4, 3840, %s41_s16, [#allocation9], %s2718_s3, %s2718_s3, %s2719_s25  }
  0x25   :  { %2706 = dma.done.wait [#allocation6], 3456  }
  0x26   :  { %2707 = vsyncadd [#allocation6], 4294963840 }
  0x27   :  { %2708 = dma.done.wait [#allocation9], 3840  }
  0x28   :  { %2709 = vsyncadd [#allocation9], 4294963456  ;;  %v2720_v0 = vmov 0.0   ;;  %vm64_vm0 = vcmask 1043456   ;;  %v2086_v1 = vld [vmem:[%s3119_s1 + $0x2] sm:$0x3] }
  0x29   :  { %242 = vmatprep.mubr.f32.mxu1 %v2720_v0  ;;  %v146_v2 = vld [vmem:[#allocation5 + $0x8] sm:$0xff]  ;;  %v148_v3 = vld [vmem:[#allocation5 + $0x20] sm:$0xff]  ;;  %s2721_s30 = smov 32   ;;  %v147_v6 = vld [vmem:[#allocation5 + $0x18] sm:$0xff]  ;;  %vm57_vm1 = vcmask 31744   ;;  %vm172_vm2 = vcmask 261120  }
  0x2a   :  { %169 = vrot.lane.b32.xlu0 %v2086_v1, %s2721_s30  ;;  %v2796_v4 = vpack.c.bf16 %v148_v3, %v146_v2  ;;  %v145_v5 = vld [vmem:[#allocation5] sm:$0xff]  ;;  %v53_v7 = vld [vmem:[#allocation8 + $0x20] sm:$0xf]  ;;  %v55_v9 = vld [vmem:[%s3118_s0] sm:$0xff]  ;;  %vm174_vm3 = vcmask 523264   ;;  %vm390_vm4 = vcmask 254976  }
  0x2b   :  { %v2798_v8 = vpack.c.bf16 %v147_v6, %v145_v5  ;;  %2175 = vmatprep.subr.msk.mxu0 %vm64_vm0, %v53_v7  ;;  %v56_v10 = vld [vmem:[%s3118_s0 + $0x8] sm:$0xff]  ;;  %v152_v12 = vld [vmem:[#allocation5 + $0x50] sm:$0xff]  ;;  %v151_v14 = vld [vmem:[#allocation5 + $0x48] sm:$0xff]  ;;  %2177 = vmatprep.mubr.msk.f32.mxu0 %vm57_vm1, %v55_v9  ;;  %vm1653_vm8 = vcmask 130048   ;;  %s2724_s16 = smov [#allocation10]   ;;  %s2725_s18 = smov [#allocation11]  }
  0x2c   :  { %v150_v11 = vld [vmem:[#allocation5 + $0x38] sm:$0xff]  ;;  %2258 = vmatprep.subr.bf16.mxu1 %v2796_v4  ;;  %2176 = vmatpush3.msk.msra.mxu0 %vm64_vm0, %v53_v7  ;;  %v149_v13 = vld [vmem:[#allocation5 + $0x30] sm:$0xff]  ;;  %v154_v17 = vld [vmem:[#allocation5 + $0x68] sm:$0xff]  ;;  %s2052_s17 = sshll.u32 %s2724_s16, 4  ;;  %s2064_s19 = sshll.u32 %s2725_s18, 4  ;;  %s2053_s17 = int_to_ptr.vmem [resolvable:$true] %s2052_s17  ;;  %s2065_s19 = int_to_ptr.vmem [resolvable:$true] %s2064_s19 }
  0x2d   :  { %2260 = vmatpush1.bf16.msra.mxu1 %v2798_v8  ;;  %v2811_v15 = vpack.c.bf16 %v152_v12, %v150_v11  ;;  %v2813_v16 = vpack.c.bf16 %v151_v14, %v149_v13  ;;  %v156_v18 = vld [vmem:[#allocation5 + $0x80] sm:$0xff]  ;;  %2178 = vmatmul.mubr.msk.f32.vlgmr.msra.gmra.mrb[0].mxu0 %vm57_vm1, %v56_v10  ;;  %v155_v21 = vld [vmem:[#allocation5 + $0x78] sm:$0xff]  ;;  %v160_v23 = vld [vmem:[#allocation5 + $0xb0] sm:$0xff]  ;;  %s2662_s20 = scalar_lea.vmem %s2053_s17, 64  ;;  %p2667_p3 = scmp.lt.s32.totalorder %s2053_s17, %s2053_s17 }
  0x2e   :  { %v2816_v19 = vpack.c.bf16 %v156_v18, %v154_v17  ;;  %v153_v20 = vld [vmem:[#allocation5 + $0x60] sm:$0xff]  ;;  %2274 = vmatprep.subr.bf16.mxu0 %v2796_v4  ;;  %v158_v22 = vld [vmem:[#allocation5 + $0x98] sm:$0xff]  ;;  %v163_v24 = vld [vmem:[%s3120_s2] sm:$0x3]  ;;  %350 = vmatprep.mubr.f32.mxu0 %v2720_v0  ;;  %p2663_p2 = scmp.ne.s32.totalorder %s2053_s17, %s2662_s20  ;;  %p2668_p4 = scmp.lt.s32.totalorder %s2662_s20, %s2662_s20 }
  0x2f   :  { %2262 = vmatprep.subr.bf16.mxu1 %v2811_v15  ;;  %2276 = vmatpush1.bf16.msra.mxu0 %v2798_v8  ;;  %v2827_v25 = vpack.c.bf16 %v155_v21, %v153_v20  ;;  %v2831_v26 = vpack.c.bf16 %v160_v23, %v158_v22  ;;  %v157_v27 = vld [vmem:[#allocation5 + $0x90] sm:$0xff]  ;;  %v159_v28 = vld [vmem:[#allocation5 + $0xa8] sm:$0xff]  ;;  %v54_v33 = vld [vmem:[#allocation8 + $0xe0] ss:$0 sm:$0xff] }
  0x30   :  { %2278 = vmatprep.subr.bf16.mxu0 %v2811_v15  ;;  %258 = vrot.lane.b32.xlu1 %v163_v24, %s2721_s30  ;;  %v2836_v29 = vpack.c.bf16 %v159_v28, %v157_v27  ;;  %v162_v30 = vld [vmem:[%s3119_s1] sm:$0x3]  ;;  %s2722_s1 = smov 64   ;;  %v2874_v58 = vld [vmem:[#allocation5 + $0xc8] ss:$0 sm:$0xff]  ;;  %vm2418_vm7 = vmpackc.low %vm172_vm2, %vm172_vm2  ;;  %p2669_p5 = por %p2668_p4, %p2667_p3 }
  0x31   :  { %2264 = vmatpush1.bf16.msra.mxu1 %v2813_v16  ;;  %v2087_v3 = vld [vmem:[%s3120_s2 + $0x2] sm:$0x3]  ;;  %s2723_s2 = smov 96  }
  0x32   :  { %2266 = vmatprep.subr.bf16.mxu1 %v2816_v19  ;;  %p2670_p6 = pnand %p2669_p5, %p2663_p2 }
  0x33   :  { %2280 = vmatpush1.bf16.msra.mxu0 %v2813_v16 }
  0x34   :  { %2282 = vmatprep.subr.bf16.mxu0 %v2816_v19 }
  0x35   :  { %2268 = vmatpush1.bf16.msra.mxu1 %v2827_v25 }
  0x36   :  { %2270 = vmatprep.subr.bf16.mxu1 %v2831_v26 }
  0x37   :  { %2284 = vmatpush1.bf16.msra.mxu0 %v2827_v25 }
  0x38   :  { %2286 = vmatprep.subr.bf16.mxu0 %v2831_v26 }
  0x39   :  { %2272 = vmatpush1.bf16.msra.mxu1 %v2836_v29 }
  0x3a   :  { %2290 = vmatprep.subr.bf16.mxu1 %v2796_v4 }
  0x3b   :  { %2288 = vmatpush1.bf16.msra.mxu0 %v2836_v29 }
  0x3c   :  { %2306 = vmatprep.subr.bf16.mxu0 %v2796_v4 }
  0x9c   :  { %v170_v31 = vpop.permute.xlu0 %169 }
  0x9d   :  { %v173_v32 = vsel %vm172_vm2, %v162_v30, %v170_v31 }
  0x9e   :  { %2088 = vmatmul.mubr.msk.f32.vlgmr.msra.gmra.mrb[0].mxu1 %vm174_vm3, %v173_v32 }
  0x9f   :  { %2292 = vmatpush1.bf16.msra.mxu1 %v2798_v8  ;;  %494 = vmatprep.mubr.f32.mxu1 %v2720_v0 }
  0xa0   :  { %2294 = vmatprep.subr.bf16.mxu1 %v2811_v15 }
  0xa2   :  { %v259_v49 = vpop.permute.xlu1 %258 }
  0xa3   :  { %2296 = vmatpush1.bf16.msra.mxu1 %v2813_v16 }
  0xa4   :  { %2298 = vmatprep.subr.bf16.mxu1 %v2816_v19 }
  0xa7   :  { %2300 = vmatpush1.bf16.msra.mxu1 %v2827_v25 }
  0xa8   :  { %2302 = vmatprep.subr.bf16.mxu1 %v2831_v26 }
  0xab   :  { %2304 = vmatpush1.bf16.msra.mxu1 %v2836_v29 }
  0xac   :  { %2322 = vmatprep.subr.bf16.mxu1 %v2796_v4 }
 0x100   :  { %v2179_v34 = vpop.f32.mrb[0].mxu0 }
 0x101   :  { %v140_v35 = vadd.f32 %v2179_v34, %v54_v33  ;;  %v134_v36 = vpop.f32.mrb[1].mxu0 }
 0x102   :  { %v135_v37 = vadd.f32 %v134_v36, %v54_v33 }
 0x103   :  { %144 = vst [vmem:[#allocation2 + $0x8] sm:$0xff] %v140_v35 }
 0x104   :  { %143 = vst [vmem:[#allocation2] sm:$0xff] %v135_v37 }
 0x10b   :  { %v248_v38 = vld [vmem:[#allocation2] ss:$8 sm:$0x3]  ;;  %v393_v60 = vld [vmem:[#allocation2 + $0x1] ss:$8 sm:$0x3] }
 0x171   :  { %v244_v39 = vpop.f32.mrb[0].mxu1 }
 0x172   :  { %v249_v40 = vadd.f32 %v248_v38, %v244_v39  ;;  %v246_v41 = vpop.f32.mrb[1].mxu1 }
 0x173   :  { %v532_v41 = vld [vmem:[#allocation2 + $0x2] ss:$8 sm:$0x3] }
 0x174   :  { %2482 = vtanh.f32 %v249_v40  ;;  %v2089_v43 = vmul.f32 -1.442695, %v249_v40 }
 0x176   :  { %2484 = vpow2.f32 %v2089_v43 }
 0x17e   :  { %v2483_v42 = vpop.eup %2482 }
 0x17f   :  { %263 = vrot.lane.b32.xlu0 %v2483_v42, %s2722_s1 }
 0x180   :  { %v2485_v44 = vpop.eup %2484 }
 0x181   :  { %v253_v45 = vadd.f32 1.0, %v2485_v44 }
 0x183   :  { %2486 = vrcp.f32 %v253_v45 }
 0x18d   :  { %v2487_v46 = vpop.eup %2486 }
 0x18e   :  { %v261_v50 = vmul.f32 %v2487_v46, %v259_v49 }
 0x1f1   :  { %v264_v47 = vpop.permute.xlu0 %263 }
 0x1f2   :  { %v266_v48 = vmul.f32 %v2487_v46, %v264_v47 }
 0x1f4   :  { %268 = vrot.lane.b32.xlu1 %v266_v48, %s2721_s30 }
 0x266   :  { %v269_v51 = vpop.permute.xlu1 %268 }
 0x267   :  { %v271_v52 = vadd.f32 %v269_v51, %v261_v50 }
 0x269   :  { %2488 = vtanh.f32 %v271_v52 }
 0x273   :  { %v2489_v53 = vpop.eup %2488 }
 0x274   :  { %274 = vrot.lane.b32.xlu0 %v2489_v53, %s2722_s1 }
 0x2e6   :  { %v275_v54 = vpop.permute.xlu0 %274 }
 0x2e7   :  { %v277_v55 = vmul.f32 %v2487_v46, %v275_v54 }
 0x2e9   :  { %279 = vrot.lane.b32.xlu1 %v277_v55, %s2721_s30 }
 0x35b   :  { %v280_v56 = vpop.permute.xlu1 %279 }
 0x35c   :  { %v282_v57 = vsel %vm172_vm2, %v280_v56, %v170_v31 }
 0x35d   :  { %2090 = vmatmul.mubr.msk.f32.vlgmr.msra.gmra.mrb[2].mxu0 %vm174_vm3, %v282_v57 }
 0x35e   :  { %2308 = vmatpush1.bf16.msra.mxu0 %v2798_v8  ;;  %633 = vmatprep.mubr.f32.mxu0 %v2720_v0 }
 0x35f   :  { %2310 = vmatprep.subr.bf16.mxu0 %v2811_v15 }
 0x362   :  { %2312 = vmatpush1.bf16.msra.mxu0 %v2813_v16 }
 0x363   :  { %2314 = vmatprep.subr.bf16.mxu0 %v2816_v19 }
 0x366   :  { %2316 = vmatpush1.bf16.msra.mxu0 %v2827_v25 }
 0x367   :  { %2318 = vmatprep.subr.bf16.mxu0 %v2831_v26 }
 0x36a   :  { %2320 = vmatpush1.bf16.msra.mxu0 %v2836_v29 }
 0x36b   :  { %2338 = vmatprep.subr.bf16.mxu0 %v2796_v4 }
 0x430   :  { %v352_v59 = vpop.f32.mrb[2].mxu0 }
 0x431   :  { %v394_v61 = vadd.f32 %v393_v60, %v352_v59  ;;  %v354_v62 = vpop.f32.mrb[3].mxu0 }
 0x432   :  { %v357_v63 = vadd.f32 %v354_v62, %v2874_v58 }
 0x433   :  { %2490 = vtanh.f32 %v394_v61  ;;  %v2092_v5 = vmul.f32 -1.442695, %v394_v61 }
 0x434   :  { %2492 = vtanh.f32 %v357_v63  ;;  %v2091_v6 = vmul.f32 -1.442695, %v357_v63 }
 0x435   :  { %2494 = vpow2.f32 %v2092_v5 }
 0x436   :  { %2496 = vpow2.f32 %v2091_v6 }
 0x43d   :  { %v2491_v1 = vpop.eup %2490 }
 0x43e   :  { %v2493_v2 = vpop.eup %2492  ;;  %404 = vrot.lane.b32.xlu1 %v2491_v1, %s2722_s1 }
 0x43f   :  { %371 = vrot.lane.b32.xlu0 %v2493_v2, %s2722_s1  ;;  %v2495_v7 = vpop.eup %2494 }
 0x440   :  { %v2497_v9 = vpop.eup %2496  ;;  %v398_v10 = vadd.f32 1.0, %v2495_v7 }
 0x441   :  { %v361_v11 = vadd.f32 1.0, %v2497_v9 }
 0x442   :  { %2498 = vrcp.f32 %v398_v10 }
 0x443   :  { %366 = vrot.lane.b32.xlu0 %v2087_v3, %s2721_s30  ;;  %2500 = vrcp.f32 %v361_v11 }
 0x44c   :  { %v2499_v12 = vpop.eup %2498 }
 0x44d   :  { %v2501_v14 = vpop.eup %2500  ;;  %v402_v22 = vmul.f32 %v2499_v12, %v271_v52 }
 0x4b0   :  { %v405_v13 = vpop.permute.xlu1 %404 }
 0x4b1   :  { %v407_v17 = vmul.f32 %v2499_v12, %v405_v13  ;;  %v372_v18 = vpop.permute.xlu0 %371 }
 0x4b2   :  { %v374_v20 = vmul.f32 %v2501_v14, %v372_v18 }
 0x4b3   :  { %409 = vrot.lane.b32.xlu0 %v407_v17, %s2721_s30  ;;  %v671_v17 = vld [vmem:[#allocation2 + $0x3] ss:$8 sm:$0x3] }
 0x4b4   :  { %376 = vrot.lane.b32.xlu1 %v374_v20, %s2721_s30 }
 0x4b5   :  { %v367_v21 = vpop.permute.xlu0 %366 }
 0x4b6   :  { %v369_v23 = vmul.f32 %v2501_v14, %v367_v21 }
 0x525   :  { %v410_v24 = vpop.permute.xlu0 %409 }
 0x526   :  { %v412_v27 = vadd.f32 %v410_v24, %v402_v22  ;;  %v377_v28 = vpop.permute.xlu1 %376 }
 0x527   :  { %v379_v30 = vadd.f32 %v377_v28, %v369_v23 }
 0x528   :  { %2502 = vtanh.f32 %v412_v27 }
 0x529   :  { %2504 = vtanh.f32 %v379_v30 }
 0x532   :  { %v2503_v31 = vpop.eup %2502 }
 0x533   :  { %v2505_v32 = vpop.eup %2504  ;;  %415 = vrot.lane.b32.xlu0 %v2503_v31, %s2722_s1 }
 0x534   :  { %382 = vrot.lane.b32.xlu1 %v2505_v32, %s2722_s1 }
 0x5a5   :  { %v416_v33 = vpop.permute.xlu0 %415 }
 0x5a6   :  { %v418_v34 = vmul.f32 %v2499_v12, %v416_v33  ;;  %v383_v35 = vpop.permute.xlu1 %382 }
 0x5a7   :  { %v2887_v36 = vmul.f32 %v2501_v14, %v383_v35 }
 0x5a8   :  { %420 = vrot.lane.b32.xlu1 %v418_v34, %s2721_s30 }
 0x5a9   :  { %423 = vrot.lane.b32.xlu0 %v2887_v36, %s2722_s1 }
 0x61a   :  { %v421_v37 = vpop.permute.xlu1 %420 }
 0x61b   :  { %v424_v38 = vpop.permute.xlu0 %423 }
 0x61c   :  { %v426_v39 = vsel %vm172_vm2, %v421_v37, %v424_v38 }
 0x61d   :  { %2093 = vmatmul.mubr.msk.f32.vlgmr.msra.gmra.mrb[2].mxu1 %vm174_vm3, %v426_v39 }
 0x61e   :  { %2324 = vmatpush1.bf16.msra.mxu1 %v2798_v8  ;;  %772 = vmatprep.mubr.f32.mxu1 %v2720_v0 }
 0x61f   :  { %2326 = vmatprep.subr.bf16.mxu1 %v2811_v15 }
 0x622   :  { %2328 = vmatpush1.bf16.msra.mxu1 %v2813_v16 }
 0x623   :  { %2330 = vmatprep.subr.bf16.mxu1 %v2816_v19 }
 0x626   :  { %2332 = vmatpush1.bf16.msra.mxu1 %v2827_v25 }
 0x627   :  { %2334 = vmatprep.subr.bf16.mxu1 %v2831_v26 }
 0x62a   :  { %2336 = vmatpush1.bf16.msra.mxu1 %v2836_v29 }
 0x62b   :  { %2354 = vmatprep.subr.bf16.mxu1 %v2796_v4 }
 0x6f0   :  { %v496_v40 = vpop.f32.mrb[2].mxu1 }
 0x6f1   :  { %v533_v42 = vadd.f32 %v532_v41, %v496_v40  ;;  %v498_v43 = vpop.f32.mrb[3].mxu1 }
 0x6f2   :  { %v501_v44 = vadd.f32 %v498_v43, %v2874_v58 }
 0x6f3   :  { %2506 = vtanh.f32 %v533_v42  ;;  %v2095_v47 = vmul.f32 -1.442695, %v533_v42 }
 0x6f4   :  { %2508 = vtanh.f32 %v501_v44  ;;  %v2094_v48 = vmul.f32 -1.442695, %v501_v44 }
 0x6f5   :  { %2510 = vpow2.f32 %v2095_v47 }
 0x6f6   :  { %2512 = vpow2.f32 %v2094_v48 }
 0x6fd   :  { %v2507_v45 = vpop.eup %2506 }
 0x6fe   :  { %v2509_v46 = vpop.eup %2508  ;;  %543 = vrot.lane.b32.xlu0 %v2507_v45, %s2722_s1 }
 0x6ff   :  { %511 = vrot.lane.b32.xlu1 %v2509_v46, %s2722_s1  ;;  %v2511_v49 = vpop.eup %2510 }
 0x700   :  { %v2513_v50 = vpop.eup %2512  ;;  %v537_v51 = vadd.f32 1.0, %v2511_v49 }
 0x701   :  { %v505_v52 = vadd.f32 1.0, %v2513_v50 }
 0x702   :  { %2514 = vrcp.f32 %v537_v51 }
 0x703   :  { %2516 = vrcp.f32 %v505_v52 }
 0x70c   :  { %v2515_v53 = vpop.eup %2514 }
 0x70d   :  { %v2517_v55 = vpop.eup %2516  ;;  %v541_v60 = vmul.f32 %v2515_v53, %v412_v27 }
 0x70e   :  { %v509_v62 = vmul.f32 %v2517_v55, %v379_v30 }
 0x770   :  { %v544_v54 = vpop.permute.xlu0 %543 }
 0x771   :  { %v546_v56 = vmul.f32 %v2515_v53, %v544_v54  ;;  %v512_v57 = vpop.permute.xlu1 %511 }
 0x772   :  { %v514_v59 = vmul.f32 %v2517_v55, %v512_v57 }
 0x773   :  { %548 = vrot.lane.b32.xlu0 %v546_v56, %s2721_s30  ;;  %v810_v56 = vld [vmem:[#allocation2 + $0x4] ss:$8 sm:$0x3] }
 0x774   :  { %516 = vrot.lane.b32.xlu1 %v514_v59, %s2721_s30 }
 0x7e5   :  { %v549_v61 = vpop.permute.xlu0 %548 }
 0x7e6   :  { %v551_v63 = vadd.f32 %v549_v61, %v541_v60  ;;  %v517_v1 = vpop.permute.xlu1 %516 }
 0x7e7   :  { %v519_v2 = vadd.f32 %v517_v1, %v509_v62 }
 0x7e8   :  { %2518 = vtanh.f32 %v551_v63 }
 0x7e9   :  { %2520 = vtanh.f32 %v519_v2 }
 0x7f2   :  { %v2519_v3 = vpop.eup %2518 }
 0x7f3   :  { %v2521_v5 = vpop.eup %2520  ;;  %554 = vrot.lane.b32.xlu0 %v2519_v3, %s2722_s1 }
 0x7f4   :  { %522 = vrot.lane.b32.xlu1 %v2521_v5, %s2722_s1 }
 0x865   :  { %v555_v6 = vpop.permute.xlu0 %554 }
 0x866   :  { %v557_v7 = vmul.f32 %v2515_v53, %v555_v6  ;;  %v523_v9 = vpop.permute.xlu1 %522 }
 0x867   :  { %v2910_v10 = vmul.f32 %v2517_v55, %v523_v9 }
 0x868   :  { %559 = vrot.lane.b32.xlu1 %v557_v7, %s2721_s30 }
 0x869   :  { %562 = vrot.lane.b32.xlu0 %v2910_v10, %s2722_s1 }
 0x8da   :  { %v560_v11 = vpop.permute.xlu1 %559 }
 0x8db   :  { %v563_v12 = vpop.permute.xlu0 %562 }
 0x8dc   :  { %v565_v13 = vsel %vm172_vm2, %v560_v11, %v563_v12 }
 0x8dd   :  { %2096 = vmatmul.mubr.msk.f32.vlgmr.msra.gmra.mrb[4].mxu0 %vm174_vm3, %v565_v13 }
 0x8de   :  { %2340 = vmatpush1.bf16.msra.mxu0 %v2798_v8  ;;  %911 = vmatprep.mubr.f32.mxu0 %v2720_v0 }
 0x8df   :  { %2342 = vmatprep.subr.bf16.mxu0 %v2811_v15 }
 0x8e2   :  { %2344 = vmatpush1.bf16.msra.mxu0 %v2813_v16 }
 0x8e3   :  { %2346 = vmatprep.subr.bf16.mxu0 %v2816_v19 }
 0x8e6   :  { %2348 = vmatpush1.bf16.msra.mxu0 %v2827_v25 }
 0x8e7   :  { %2350 = vmatprep.subr.bf16.mxu0 %v2831_v26 }
 0x8ea   :  { %2352 = vmatpush1.bf16.msra.mxu0 %v2836_v29 }
 0x8eb   :  { %2370 = vmatprep.subr.bf16.mxu0 %v2796_v4 }
 0x9b0   :  { %v635_v14 = vpop.f32.mrb[4].mxu0 }
 0x9b1   :  { %v672_v18 = vadd.f32 %v671_v17, %v635_v14  ;;  %v637_v20 = vpop.f32.mrb[5].mxu0 }
 0x9b2   :  { %v640_v21 = vadd.f32 %v637_v20, %v2874_v58 }
 0x9b3   :  { %2522 = vtanh.f32 %v672_v18  ;;  %v2098_v24 = vmul.f32 -1.442695, %v672_v18 }
 0x9b4   :  { %2524 = vtanh.f32 %v640_v21  ;;  %v2097_v27 = vmul.f32 -1.442695, %v640_v21 }
 0x9b5   :  { %2526 = vpow2.f32 %v2098_v24 }
 0x9b6   :  { %2528 = vpow2.f32 %v2097_v27 }
 0x9bd   :  { %v2523_v22 = vpop.eup %2522 }
 0x9be   :  { %v2525_v23 = vpop.eup %2524  ;;  %682 = vrot.lane.b32.xlu0 %v2523_v22, %s2722_s1 }
 0x9bf   :  { %650 = vrot.lane.b32.xlu1 %v2525_v23, %s2722_s1  ;;  %v2527_v28 = vpop.eup %2526 }
 0x9c0   :  { %v2529_v30 = vpop.eup %2528  ;;  %v676_v31 = vadd.f32 1.0, %v2527_v28 }
 0x9c1   :  { %v644_v32 = vadd.f32 1.0, %v2529_v30 }
 0x9c2   :  { %2530 = vrcp.f32 %v676_v31 }
 0x9c3   :  { %2532 = vrcp.f32 %v644_v32 }
 0x9cc   :  { %v2531_v33 = vpop.eup %2530 }
 0x9cd   :  { %v2533_v35 = vpop.eup %2532  ;;  %v680_v40 = vmul.f32 %v2531_v33, %v551_v63 }
 0x9ce   :  { %v648_v42 = vmul.f32 %v2533_v35, %v519_v2 }
 0xa30   :  { %v683_v34 = vpop.permute.xlu0 %682 }
 0xa31   :  { %v685_v37 = vmul.f32 %v2531_v33, %v683_v34  ;;  %v651_v38 = vpop.permute.xlu1 %650 }
 0xa32   :  { %v653_v39 = vmul.f32 %v2533_v35, %v651_v38 }
 0xa33   :  { %687 = vrot.lane.b32.xlu0 %v685_v37, %s2721_s30  ;;  %v949_v37 = vld [vmem:[#allocation2 + $0x5] ss:$8 sm:$0x3] }
 0xa34   :  { %655 = vrot.lane.b32.xlu1 %v653_v39, %s2721_s30 }
 0xaa5   :  { %v688_v41 = vpop.permute.xlu0 %687 }
 0xaa6   :  { %v690_v43 = vadd.f32 %v688_v41, %v680_v40  ;;  %v656_v44 = vpop.permute.xlu1 %655 }
 0xaa7   :  { %v658_v45 = vadd.f32 %v656_v44, %v648_v42 }
 0xaa8   :  { %2534 = vtanh.f32 %v690_v43 }
 0xaa9   :  { %2536 = vtanh.f32 %v658_v45 }
 0xab2   :  { %v2535_v46 = vpop.eup %2534 }
 0xab3   :  { %v2537_v47 = vpop.eup %2536  ;;  %693 = vrot.lane.b32.xlu0 %v2535_v46, %s2722_s1 }
 0xab4   :  { %661 = vrot.lane.b32.xlu1 %v2537_v47, %s2722_s1 }
 0xb25   :  { %v694_v48 = vpop.permute.xlu0 %693 }
 0xb26   :  { %v696_v49 = vmul.f32 %v2531_v33, %v694_v48  ;;  %v662_v50 = vpop.permute.xlu1 %661 }
 0xb27   :  { %v2933_v51 = vmul.f32 %v2533_v35, %v662_v50 }
 0xb28   :  { %698 = vrot.lane.b32.xlu1 %v696_v49, %s2721_s30 }
 0xb29   :  { %701 = vrot.lane.b32.xlu0 %v2933_v51, %s2722_s1 }
 0xb9a   :  { %v699_v52 = vpop.permute.xlu1 %698 }
 0xb9b   :  { %v702_v53 = vpop.permute.xlu0 %701 }
 0xb9c   :  { %v704_v54 = vsel %vm172_vm2, %v699_v52, %v702_v53 }
 0xb9d   :  { %2099 = vmatmul.mubr.msk.f32.vlgmr.msra.gmra.mrb[4].mxu1 %vm174_vm3, %v704_v54 }
 0xb9e   :  { %2356 = vmatpush1.bf16.msra.mxu1 %v2798_v8  ;;  %1050 = vmatprep.mubr.f32.mxu1 %v2720_v0 }
 0xb9f   :  { %2358 = vmatprep.subr.bf16.mxu1 %v2811_v15 }
 0xba2   :  { %2360 = vmatpush1.bf16.msra.mxu1 %v2813_v16 }
 0xba3   :  { %2362 = vmatprep.subr.bf16.mxu1 %v2816_v19 }
 0xba6   :  { %2364 = vmatpush1.bf16.msra.mxu1 %v2827_v25 }
 0xba7   :  { %2366 = vmatprep.subr.bf16.mxu1 %v2831_v26 }
 0xbaa   :  { %2368 = vmatpush1.bf16.msra.mxu1 %v2836_v29 }
 0xbab   :  { %2386 = vmatprep.subr.bf16.mxu1 %v2796_v4 }
 0xc70   :  { %v774_v55 = vpop.f32.mrb[4].mxu1 }
 0xc71   :  { %v811_v57 = vadd.f32 %v810_v56, %v774_v55  ;;  %v776_v59 = vpop.f32.mrb[5].mxu1 }
 0xc72   :  { %v779_v60 = vadd.f32 %v776_v59, %v2874_v58 }
 0xc73   :  { %2538 = vtanh.f32 %v811_v57  ;;  %v2101_v63 = vmul.f32 -1.442695, %v811_v57 }
 0xc74   :  { %2540 = vtanh.f32 %v779_v60  ;;  %v2100_v1 = vmul.f32 -1.442695, %v779_v60 }
 0xc75   :  { %2542 = vpow2.f32 %v2101_v63 }
 0xc76   :  { %2544 = vpow2.f32 %v2100_v1 }
 0xc7d   :  { %v2539_v61 = vpop.eup %2538 }
 0xc7e   :  { %v2541_v62 = vpop.eup %2540  ;;  %821 = vrot.lane.b32.xlu0 %v2539_v61, %s2722_s1 }
 0xc7f   :  { %789 = vrot.lane.b32.xlu1 %v2541_v62, %s2722_s1  ;;  %v2543_v2 = vpop.eup %2542 }
 0xc80   :  { %v2545_v4 = vpop.eup %2544  ;;  %v815_v3 = vadd.f32 1.0, %v2543_v2 }
 0xc81   :  { %v783_v5 = vadd.f32 1.0, %v2545_v4 }
 0xc82   :  { %2546 = vrcp.f32 %v815_v3 }
 0xc83   :  { %2548 = vrcp.f32 %v783_v5 }
 0xc8c   :  { %v2547_v6 = vpop.eup %2546 }
 0xc8d   :  { %v2549_v9 = vpop.eup %2548  ;;  %v819_v14 = vmul.f32 %v2547_v6, %v690_v43 }
 0xc8e   :  { %v787_v18 = vmul.f32 %v2549_v9, %v658_v45 }
 0xcf0   :  { %v822_v7 = vpop.permute.xlu0 %821 }
 0xcf1   :  { %v824_v11 = vmul.f32 %v2547_v6, %v822_v7  ;;  %v790_v12 = vpop.permute.xlu1 %789 }
 0xcf2   :  { %v792_v13 = vmul.f32 %v2549_v9, %v790_v12  ;;  %v1088_v12 = vld [vmem:[#allocation2 + $0x6] ss:$8 sm:$0x3] }
 0xcf3   :  { %826 = vrot.lane.b32.xlu0 %v824_v11, %s2721_s30 }
 0xcf4   :  { %794 = vrot.lane.b32.xlu1 %v792_v13, %s2721_s30 }
 0xd65   :  { %v827_v17 = vpop.permute.xlu0 %826 }
 0xd66   :  { %v829_v20 = vadd.f32 %v827_v17, %v819_v14  ;;  %v795_v21 = vpop.permute.xlu1 %794 }
 0xd67   :  { %v797_v22 = vadd.f32 %v795_v21, %v787_v18 }
 0xd68   :  { %2550 = vtanh.f32 %v829_v20 }
 0xd69   :  { %2552 = vtanh.f32 %v797_v22 }
 0xd72   :  { %v2551_v23 = vpop.eup %2550 }
 0xd73   :  { %v2553_v24 = vpop.eup %2552  ;;  %832 = vrot.lane.b32.xlu0 %v2551_v23, %s2722_s1 }
 0xd74   :  { %800 = vrot.lane.b32.xlu1 %v2553_v24, %s2722_s1 }
 0xde5   :  { %v833_v27 = vpop.permute.xlu0 %832 }
 0xde6   :  { %v835_v28 = vmul.f32 %v2547_v6, %v833_v27  ;;  %v801_v30 = vpop.permute.xlu1 %800 }
 0xde7   :  { %v2956_v31 = vmul.f32 %v2549_v9, %v801_v30 }
 0xde8   :  { %837 = vrot.lane.b32.xlu1 %v835_v28, %s2721_s30 }
 0xde9   :  { %840 = vrot.lane.b32.xlu0 %v2956_v31, %s2722_s1 }
 0xe5a   :  { %v838_v32 = vpop.permute.xlu1 %837 }
 0xe5b   :  { %v841_v33 = vpop.permute.xlu0 %840 }
 0xe5c   :  { %v843_v34 = vsel %vm172_vm2, %v838_v32, %v841_v33 }
 0xe5d   :  { %2102 = vmatmul.mubr.msk.f32.vlgmr.msra.gmra.mrb[6].mxu0 %vm174_vm3, %v843_v34 }
 0xe5e   :  { %2372 = vmatpush1.bf16.msra.mxu0 %v2798_v8  ;;  %1189 = vmatprep.mubr.f32.mxu0 %v2720_v0 }
 0xe5f   :  { %2374 = vmatprep.subr.bf16.mxu0 %v2811_v15 }
 0xe62   :  { %2376 = vmatpush1.bf16.msra.mxu0 %v2813_v16 }
 0xe63   :  { %2378 = vmatprep.subr.bf16.mxu0 %v2816_v19 }
 0xe66   :  { %2380 = vmatpush1.bf16.msra.mxu0 %v2827_v25 }
 0xe67   :  { %2382 = vmatprep.subr.bf16.mxu0 %v2831_v26 }
 0xe6a   :  { %2384 = vmatpush1.bf16.msra.mxu0 %v2836_v29 }
 0xf30   :  { %v913_v35 = vpop.f32.mrb[6].mxu0 }
 0xf31   :  { %v950_v38 = vadd.f32 %v949_v37, %v913_v35  ;;  %v915_v39 = vpop.f32.mrb[7].mxu0 }
 0xf32   :  { %v918_v40 = vadd.f32 %v915_v39, %v2874_v58 }
 0xf33   :  { %2554 = vtanh.f32 %v950_v38  ;;  %v2104_v43 = vmul.f32 -1.442695, %v950_v38 }
 0xf34   :  { %2556 = vtanh.f32 %v918_v40  ;;  %v2103_v44 = vmul.f32 -1.442695, %v918_v40 }
 0xf35   :  { %2558 = vpow2.f32 %v2104_v43 }
 0xf36   :  { %2560 = vpow2.f32 %v2103_v44 }
 0xf3d   :  { %v2555_v41 = vpop.eup %2554 }
 0xf3e   :  { %v2557_v42 = vpop.eup %2556  ;;  %960 = vrot.lane.b32.xlu0 %v2555_v41, %s2722_s1 }
 0xf3f   :  { %928 = vrot.lane.b32.xlu1 %v2557_v42, %s2722_s1  ;;  %v2559_v45 = vpop.eup %2558 }
 0xf40   :  { %v2561_v46 = vpop.eup %2560  ;;  %v954_v47 = vadd.f32 1.0, %v2559_v45 }
 0xf41   :  { %v922_v48 = vadd.f32 1.0, %v2561_v46  ;;  %v1227_v46 = vld [vmem:[#allocation2 + $0x7] ss:$8 sm:$0x3] }
 0xf42   :  { %2562 = vrcp.f32 %v954_v47 }
 0xf43   :  { %2564 = vrcp.f32 %v922_v48 }
 0xf4c   :  { %v2563_v49 = vpop.eup %2562 }
 0xf4d   :  { %v2565_v52 = vpop.eup %2564  ;;  %v958_v56 = vmul.f32 %v2563_v49, %v829_v20 }
 0xf4e   :  { %v926_v59 = vmul.f32 %v2565_v52, %v797_v22 }
 0xfb0   :  { %v961_v50 = vpop.permute.xlu0 %960 }
 0xfb1   :  { %v963_v53 = vmul.f32 %v2563_v49, %v961_v50  ;;  %v929_v54 = vpop.permute.xlu1 %928 }
 0xfb2   :  { %v931_v55 = vmul.f32 %v2565_v52, %v929_v54 }
 0xfb3   :  { %965 = vrot.lane.b32.xlu0 %v963_v53, %s2721_s30 }
 0xfb4   :  { %933 = vrot.lane.b32.xlu1 %v931_v55, %s2721_s30 }
0x1025   :  { %v966_v57 = vpop.permute.xlu0 %965 }
0x1026   :  { %v968_v60 = vadd.f32 %v966_v57, %v958_v56  ;;  %v934_v61 = vpop.permute.xlu1 %933 }
0x1027   :  { %v936_v62 = vadd.f32 %v934_v61, %v926_v59 }
0x1028   :  { %2566 = vtanh.f32 %v968_v60 }
0x1029   :  { %2568 = vtanh.f32 %v936_v62 }
0x1032   :  { %v2567_v63 = vpop.eup %2566 }
0x1033   :  { %v2569_v1 = vpop.eup %2568  ;;  %971 = vrot.lane.b32.xlu0 %v2567_v63, %s2722_s1 }
0x1034   :  { %939 = vrot.lane.b32.xlu1 %v2569_v1, %s2722_s1 }
0x10a5   :  { %v972_v2 = vpop.permute.xlu0 %971 }
0x10a6   :  { %v974_v4 = vmul.f32 %v2563_v49, %v972_v2  ;;  %v940_v3 = vpop.permute.xlu1 %939 }
0x10a7   :  { %v2978_v5 = vmul.f32 %v2565_v52, %v940_v3 }
0x10a8   :  { %976 = vrot.lane.b32.xlu1 %v974_v4, %s2721_s30 }
0x10a9   :  { %979 = vrot.lane.b32.xlu0 %v2978_v5, %s2722_s1 }
0x111a   :  { %v977_v6 = vpop.permute.xlu1 %976 }
0x111b   :  { %v980_v7 = vpop.permute.xlu0 %979 }
0x111c   :  { %v982_v9 = vsel %vm172_vm2, %v977_v6, %v980_v7 }
0x111d   :  { %2105 = vmatmul.mubr.msk.f32.vlgmr.msra.gmra.mrb[6].mxu1 %vm174_vm3, %v982_v9 }
0x111e   :  { %2388 = vmatpush1.bf16.msra.mxu1 %v2798_v8  ;;  %1328 = vmatprep.mubr.f32.mxu1 %v2720_v0 }
0x111f   :  { %2390 = vmatprep.subr.bf16.mxu1 %v2811_v15 }
0x1122   :  { %2392 = vmatpush1.bf16.msra.mxu1 %v2813_v16 }
0x1123   :  { %2394 = vmatprep.subr.bf16.mxu1 %v2816_v19 }
0x1126   :  { %2396 = vmatpush1.bf16.msra.mxu1 %v2827_v25 }
0x1127   :  { %2398 = vmatprep.subr.bf16.mxu1 %v2831_v26 }
0x112a   :  { %2400 = vmatpush1.bf16.msra.mxu1 %v2836_v29 }
0x11f0   :  { %v1052_v11 = vpop.f32.mrb[6].mxu1 }
0x11f1   :  { %v1089_v13 = vadd.f32 %v1088_v12, %v1052_v11  ;;  %v1054_v14 = vpop.f32.mrb[7].mxu1 }
0x11f2   :  { %v1057_v8 = vadd.f32 %v1054_v14, %v2874_v58 }
0x11f3   :  { %2570 = vtanh.f32 %v1089_v13  ;;  %v2107_v16 = vmul.f32 -1.442695, %v1089_v13 }
0x11f4   :  { %2572 = vtanh.f32 %v1057_v8  ;;  %v2106_v19 = vmul.f32 -1.442695, %v1057_v8 }
0x11f5   :  { %2574 = vpow2.f32 %v2107_v16 }
0x11f6   :  { %2576 = vpow2.f32 %v2106_v19 }
0x11fd   :  { %v2571_v0 = vpop.eup %2570 }
0x11fe   :  { %v2573_v15 = vpop.eup %2572  ;;  %1099 = vrot.lane.b32.xlu0 %v2571_v0, %s2722_s1 }
0x11ff   :  { %1067 = vrot.lane.b32.xlu1 %v2573_v15, %s2722_s1  ;;  %v2575_v25 = vpop.eup %2574 }
0x1200   :  { %v2577_v26 = vpop.eup %2576  ;;  %v1093_v29 = vadd.f32 1.0, %v2575_v25 }
0x1201   :  { %v1061_v17 = vadd.f32 1.0, %v2577_v26 }
0x1202   :  { %2578 = vrcp.f32 %v1093_v29 }
0x1203   :  { %2580 = vrcp.f32 %v1061_v17 }
0x120c   :  { %v2579_v18 = vpop.eup %2578 }
0x120d   :  { %v2581_v21 = vpop.eup %2580  ;;  %v1097_v27 = vmul.f32 %v2579_v18, %v968_v60 }
0x120e   :  { %v1065_v30 = vmul.f32 %v2581_v21, %v936_v62 }
0x1270   :  { %v1100_v20 = vpop.permute.xlu0 %1099 }
0x1271   :  { %v1102_v22 = vmul.f32 %v2579_v18, %v1100_v20  ;;  %v1068_v23 = vpop.permute.xlu1 %1067 }
0x1272   :  { %v1070_v24 = vmul.f32 %v2581_v21, %v1068_v23 }
0x1273   :  { %1104 = vrot.lane.b32.xlu0 %v1102_v22, %s2721_s30 }
0x1274   :  { %1072 = vrot.lane.b32.xlu1 %v1070_v24, %s2721_s30 }
0x12e5   :  { %v1105_v28 = vpop.permute.xlu0 %1104 }
0x12e6   :  { %v1107_v32 = vadd.f32 %v1105_v28, %v1097_v27  ;;  %v1073_v33 = vpop.permute.xlu1 %1072 }
0x12e7   :  { %v1075_v34 = vadd.f32 %v1073_v33, %v1065_v30 }
0x12e8   :  { %2582 = vtanh.f32 %v1107_v32 }
0x12e9   :  { %2584 = vtanh.f32 %v1075_v34 }
0x12f2   :  { %v2583_v35 = vpop.eup %2582 }
0x12f3   :  { %v2585_v37 = vpop.eup %2584  ;;  %1110 = vrot.lane.b32.xlu0 %v2583_v35, %s2722_s1  ;;  %v1381_v35 = vld [vmem:[#allocation8 + $0x30] sm:$0xff] }
0x12f4   :  { %1078 = vrot.lane.b32.xlu1 %v2585_v37, %s2722_s1 }
0x1365   :  { %v1111_v38 = vpop.permute.xlu0 %1110 }
0x1366   :  { %v1113_v39 = vmul.f32 %v2579_v18, %v1111_v38  ;;  %v1079_v40 = vpop.permute.xlu1 %1078  ;;  %v1382_v38 = vld [vmem:[#allocation8 + $0x60] sm:$0xff] }
0x1367   :  { %v3000_v41 = vmul.f32 %v2581_v21, %v1079_v40 }
0x1368   :  { %1115 = vrot.lane.b32.xlu1 %v1113_v39, %s2721_s30  ;;  %v1383_v39 = vld [vmem:[#allocation8 + $0x90] sm:$0xff] }
0x1369   :  { %1118 = vrot.lane.b32.xlu0 %v3000_v41, %s2722_s1  ;;  %v2405_v40 = vpack.c.bf16 %v1383_v39, %v1382_v38 }
0x13da   :  { %v1116_v42 = vpop.permute.xlu1 %1115 }
0x13db   :  { %v1119_v43 = vpop.permute.xlu0 %1118 }
0x13dc   :  { %v1121_v44 = vsel %vm172_vm2, %v1116_v42, %v1119_v43 }
0x13dd   :  { %2108 = vmatmul.mubr.msk.f32.vlgmr.msra.gmra.mrb[8].mxu0 %vm174_vm3, %v1121_v44 }
0x14b0   :  { %v1191_v45 = vpop.f32.mrb[8].mxu0 }
0x14b1   :  { %v1228_v47 = vadd.f32 %v1227_v46, %v1191_v45  ;;  %v1193_v48 = vpop.f32.mrb[9].mxu0 }
0x14b2   :  { %v1196_v49 = vadd.f32 %v1193_v48, %v2874_v58  ;;  %v1473_v48 = vld [vmem:[#allocation8 + $0x38] sm:$0xff] }
0x14b3   :  { %2586 = vtanh.f32 %v1228_v47  ;;  %v2110_v53 = vmul.f32 -1.442695, %v1228_v47  ;;  %v1472_v47 = vld [vmem:[#allocation8 + $0x8] sm:$0xff] }
0x14b4   :  { %2588 = vtanh.f32 %v1196_v49  ;;  %v2109_v54 = vmul.f32 -1.442695, %v1196_v49  ;;  %v2409_v49 = vpack.c.bf16 %v1473_v48, %v1472_v47  ;;  %v1771_v47 = vld [vmem:[#allocation8 + $0x70] sm:$0xff]  ;;  %v1772_v48 = vld [vmem:[#allocation8 + $0xa0] sm:$0xff] }
0x14b5   :  { %2590 = vpow2.f32 %v2110_v53 }
0x14b6   :  { %2592 = vpow2.f32 %v2109_v54  ;;  %v1384_v54 = vld [vmem:[#allocation8 + $0xc0] ss:$0 sm:$0xff] }
0x14bd   :  { %v2587_v50 = vpop.eup %2586 }
0x14be   :  { %v2589_v52 = vpop.eup %2588  ;;  %1238 = vrot.lane.b32.xlu0 %v2587_v50, %s2722_s1  ;;  %v1474_v50 = vld [vmem:[#allocation8 + $0x68] sm:$0xff] }
0x14bf   :  { %1206 = vrot.lane.b32.xlu1 %v2589_v52, %s2722_s1  ;;  %v2591_v55 = vpop.eup %2590  ;;  %v1475_v52 = vld [vmem:[#allocation8 + $0x98] sm:$0xff] }
0x14c0   :  { %v2593_v56 = vpop.eup %2592  ;;  %v1232_v57 = vadd.f32 1.0, %v2591_v55  ;;  %v2413_v53 = vpack.c.bf16 %v1475_v52, %v1474_v50  ;;  %v2431_v52 = vpack.c.bf16 %v1772_v48, %v1771_v47 }
0x14c1   :  { %v1200_v59 = vadd.f32 1.0, %v2593_v56 }
0x14c2   :  { %2594 = vrcp.f32 %v1232_v57 }
0x14c3   :  { %2596 = vrcp.f32 %v1200_v59 }
0x14cc   :  { %v2595_v60 = vpop.eup %2594 }
0x14cd   :  { %v2597_v62 = vpop.eup %2596  ;;  %v1236_v4 = vmul.f32 %v2595_v60, %v1107_v32 }
0x14ce   :  { %v1204_v6 = vmul.f32 %v2597_v62, %v1075_v34 }
0x1530   :  { %v1239_v61 = vpop.permute.xlu0 %1238 }
0x1531   :  { %v1241_v63 = vmul.f32 %v2595_v60, %v1239_v61  ;;  %v1207_v1 = vpop.permute.xlu1 %1206 }
0x1532   :  { %v1209_v2 = vmul.f32 %v2597_v62, %v1207_v1  ;;  %v1476_v1 = vld [vmem:[#allocation8 + $0xc8] ss:$0 sm:$0xff] }
0x1533   :  { %1243 = vrot.lane.b32.xlu0 %v1241_v63, %s2721_s30 }
0x1534   :  { %1211 = vrot.lane.b32.xlu1 %v1209_v2, %s2721_s30 }
0x15a5   :  { %v1244_v3 = vpop.permute.xlu0 %1243 }
0x15a6   :  { %v3012_v7 = vadd.f32 %v1244_v3, %v1236_v4  ;;  %v1212_v9 = vpop.permute.xlu1 %1211 }
0x15a7   :  { %v1214_v11 = vadd.f32 %v1212_v9, %v1204_v6 }
0x15a8   :  { %2598 = vtanh.f32 %v3012_v7 }
0x15a9   :  { %2600 = vtanh.f32 %v1214_v11 }
0x15b2   :  { %v2599_v12 = vpop.eup %2598 }
0x15b3   :  { %v2601_v13 = vpop.eup %2600  ;;  %1249 = vrot.lane.b32.xlu0 %v2599_v12, %s2722_s1 }
0x15b4   :  { %1217 = vrot.lane.b32.xlu1 %v2601_v13, %s2722_s1 }
0x1625   :  { %v1250_v14 = vpop.permute.xlu0 %1249 }
0x1626   :  { %v1252_v8 = vmul.f32 %v2595_v60, %v1250_v14  ;;  %v1218_v0 = vpop.permute.xlu1 %1217 }
0x1627   :  { %v1220_v15 = vmul.f32 %v2597_v62, %v1218_v0  ;;  %v1650_v0 = vld [vmem:[#allocation8 + $0x58] sm:$0xff] }
0x1628   :  { %1254 = vrot.lane.b32.xlu1 %v1252_v8, %s2721_s30 }
0x1629   :  { %1257 = vrot.lane.b32.xlu0 %v1220_v15, %s2722_s1 }
0x169a   :  { %v1255_v16 = vpop.permute.xlu1 %1254 }
0x169b   :  { %1364 = vst.msk [vmem:[#allocation10] sm:$0x3] %vm390_vm4, %v1255_v16  ;;  %v1258_v19 = vpop.permute.xlu0 %1257 }
0x169c   :  { %v1260_v25 = vsel %vm172_vm2, %v1255_v16, %v1258_v19  ;;  %v1649_v19 = vld [vmem:[#allocation8 + $0x28] sm:$0xff] }
0x169d   :  { %2111 = vmatmul.mubr.msk.f32.vlgmr.msra.gmra.mrb[8].mxu1 %vm174_vm3, %v1260_v25 }
0x1770   :  { %v1330_v26 = vpop.f32.mrb[8].mxu1 }
0x1771   :  { %v1331_v29 = vpop.f32.mrb[9].mxu1 }
0x1772   :  { %v1334_v17 = vadd.f32 %v1331_v29, %v2874_v58 }
0x1774   :  { %2602 = vtanh.f32 %v1334_v17  ;;  %v2112_v20 = vmul.f32 -1.442695, %v1334_v17 }
0x1776   :  { %2604 = vpow2.f32 %v2112_v20 }
0x177e   :  { %v2603_v18 = vpop.eup %2602 }
0x177f   :  { %1344 = vrot.lane.b32.xlu1 %v2603_v18, %s2722_s1 }
0x1780   :  { %v2605_v21 = vpop.eup %2604 }
0x1781   :  { %v1338_v22 = vadd.f32 1.0, %v2605_v21 }
0x1783   :  { %2606 = vrcp.f32 %v1338_v22 }
0x178d   :  { %v2607_v23 = vpop.eup %2606 }
0x178e   :  { %v1342_v58 = vmul.f32 %v2607_v23, %v1214_v11 }
0x17f1   :  { %v1345_v24 = vpop.permute.xlu1 %1344 }
0x17f2   :  { %v1347_v27 = vmul.f32 %v2607_v23, %v1345_v24 }
0x17f4   :  { %1349 = vrot.lane.b32.xlu0 %v1347_v27, %s2721_s30 }
0x17f8   :  { %387 = vrot.lane.b32.xlu0 %v2887_v36, %s2721_s30 }
0x17fc   :  { %666 = vrot.lane.b32.xlu0 %v2933_v51, %s2721_s30 }
0x1800   :  { %944 = vrot.lane.b32.xlu0 %v2978_v5, %s2721_s30  ;;  %v1380_v5 = vld [vmem:[#allocation8] sm:$0xff] }
0x1801   :  { %v2401_v37 = vpack.c.bf16 %v1381_v35, %v1380_v5  ;;  %v1769_v35 = vld [vmem:[#allocation8 + $0x10] sm:$0xff] }
0x1803   :  { %2402 = vmatprep.subr.bf16.mxu0 %v2401_v37 }
0x1804   :  { %1222 = vrot.lane.b32.xlu0 %v1220_v15, %s2721_s30  ;;  %2404 = vmatpush3.bf16.msra.mxu0 %v2401_v37  ;;  %v1770_v37 = vld [vmem:[#allocation8 + $0x40] sm:$0xff] }
0x1805   :  { %2406 = vmatprep.subr.bf16.mxu0 %v2405_v40 }
0x1808   :  { %2408 = vmatpush3.bf16.msra.mxu0 %v2405_v40 }
0x1809   :  { %2410 = vmatprep.subr.bf16.mxu0 %v2409_v49 }
0x1866   :  { %v1350_v28 = vpop.permute.xlu0 %1349 }
0x1867   :  { %v3032_v30 = vadd.f32 %v1350_v28, %v1342_v58 }
0x1869   :  { %2608 = vtanh.f32 %v3032_v30 }
0x186a   :  { %v388_v32 = vpop.permute.xlu0 %387 }
0x186b   :  { %391 = vst.msk [vmem:[#allocation3] sm:$0x3] %vm390_vm4, %v388_v32 }
0x186e   :  { %v667_v33 = vpop.permute.xlu0 %666 }
0x186f   :  { %669 = vst.msk [vmem:[#allocation3 + $0x4] sm:$0x3] %vm390_vm4, %v667_v33 }
0x1872   :  { %v945_v36 = vpop.permute.xlu0 %944 }
0x1873   :  { %v2609_v34 = vpop.eup %2608  ;;  %947 = vst.msk [vmem:[#allocation3 + $0x8] sm:$0x3] %vm390_vm4, %v945_v36 }
0x1874   :  { %1355 = vrot.lane.b32.xlu1 %v2609_v34, %s2722_s1 }
0x1876   :  { %v1223_v51 = vpop.permute.xlu0 %1222 }
0x1877   :  { %1225 = vst.msk [vmem:[#allocation3 + $0xc] sm:$0x3] %vm390_vm4, %v1223_v51 }
0x1878   :  { %527 = vrot.lane.b32.xlu1 %v2910_v10, %s2721_s30 }
0x187c   :  { %805 = vrot.lane.b32.xlu1 %v2956_v31, %s2721_s30 }
0x1880   :  { %1083 = vrot.lane.b32.xlu1 %v3000_v41, %s2721_s30 }
0x18e6   :  { %v1356_v42 = vpop.permute.xlu1 %1355 }
0x18e7   :  { %v1358_v43 = vmul.f32 %v2607_v23, %v1356_v42 }
0x18e9   :  { %1360 = vrot.lane.b32.xlu1 %v1358_v43, %s2721_s30 }
0x18ea   :  { %v528_v10 = vpop.permute.xlu1 %527 }
0x18eb   :  { %530 = vst.msk [vmem:[#allocation3 + $0x2] sm:$0x3] %vm390_vm4, %v528_v10 }
0x18ee   :  { %v806_v31 = vpop.permute.xlu1 %805 }
0x18ef   :  { %808 = vst.msk [vmem:[#allocation3 + $0x6] sm:$0x3] %vm390_vm4, %v806_v31 }
0x18f2   :  { %v1084_v41 = vpop.permute.xlu1 %1083 }
0x18f3   :  { %1086 = vst.msk [vmem:[#allocation3 + $0xa] sm:$0x3] %vm390_vm4, %v1084_v41 }
0x18f6   :  { %v1378_v44 = vld [vmem:[#allocation3] sm:$0xff] }
0x18f7   :  { %2188 = vmatprep.mubr.msk.f32.mxu0 %vm172_vm2, %v1378_v44 }
0x195b   :  { %v1361_v45 = vpop.permute.xlu1 %1360 }
0x195c   :  { %1363 = vst.msk [vmem:[#allocation3 + $0xe] sm:$0x3] %vm390_vm4, %v1361_v45  ;;  %1366 = vst.msk [vmem:[#allocation10 + $0x2] sm:$0x3] %vm390_vm4, %v1361_v45 }
0x1963   :  { %v1379_v46 = vld [vmem:[#allocation3 + $0x8] sm:$0xff] }
0x1964   :  { %2189 = vmatmul.mubr.msk.f32.vlgmr.msra.gmra.mrb[10].mxu0 %vm172_vm2, %v1379_v46 }
0x1965   :  { %2412 = vmatpush3.bf16.msra.mxu0 %v2409_v49 }
0x1966   :  { %2414 = vmatprep.subr.bf16.mxu0 %v2413_v53 }
0x1969   :  { %2416 = vmatpush3.bf16.msra.mxu0 %v2413_v53  ;;  %v1857_v53 = vld [vmem:[#allocation5 + $0x10] sm:$0xff] }
0x1a37   :  { %v2190_v55 = vpop.f32.mrb[10].mxu0 }
0x1a38   :  { %v1463_v56 = vadd.f32 %v2190_v55, %v1384_v54  ;;  %v1457_v57 = vpop.f32.mrb[11].mxu0  ;;  %v1859_v55 = vld [vmem:[#allocation5 + $0x40] sm:$0xff] }
0x1a39   :  { %v1458_v59 = vadd.f32 %v1457_v57, %v1384_v54  ;;  %v1858_v54 = vld [vmem:[#allocation5 + $0x28] sm:$0xff]  ;;  %v1860_v57 = vld [vmem:[#allocation5 + $0x58] sm:$0xff] }
0x1a3a   :  { %v1469_v60 = vmul.f32 0.01, %v1463_v56  ;;  %vm1467_vm5 = vcmp.gt.f32.partialorder %v1463_v56, 0.0 }
0x1a3b   :  { %vm1466_vm6 = vcmp.gt.f32.partialorder %v1458_v59, 0.0  ;;  %v1468_v61 = vmul.f32 0.01, %v1458_v59 }
0x1a3c   :  { %v1471_v63 = vsel %vm1467_vm5, %v1463_v56, %v1469_v60  ;;  %v2435_v56 = vpack.c.bf16 %v1858_v54, %v1857_v53  ;;  %v1861_v60 = vld [vmem:[#allocation5 + $0x70] sm:$0xff] }
0x1a3d   :  { %v1470_v62 = vsel %vm1466_vm6, %v1458_v59, %v1468_v61  ;;  %v2439_v59 = vpack.c.bf16 %v1860_v57, %v1859_v55  ;;  %v1862_v61 = vld [vmem:[#allocation5 + $0x88] sm:$0xff] }
0x1a3e   :  { %2199 = vmatprep.mubr.msk.f32.mxu0 %vm172_vm2, %v1470_v62  ;;  %v2443_v62 = vpack.c.bf16 %v1862_v61, %v1861_v60 }
0x1a3f   :  { %2200 = vmatmul.mubr.msk.f32.vlgmr.msra.gmra.mrb[12].mxu0 %vm172_vm2, %v1471_v63 }
0x1b12   :  { %v2201_v2 = vpop.f32.mrb[12].mxu0 }
0x1b13   :  { %v1555_v4 = vadd.f32 %v2201_v2, %v1476_v1  ;;  %v1549_v3 = vpop.f32.mrb[13].mxu0  ;;  %v1863_v2 = vld [vmem:[#allocation5 + $0xa0] sm:$0xff] }
0x1b14   :  { %v1550_v6 = vadd.f32 %v1549_v3, %v1476_v1 }
0x1b16   :  { %2206 = vmatprep.mubr.msk.f32.mxu1 %vm172_vm2, %v1550_v6  ;;  %v2472_v9 = vpack.i.bf16 %v1555_v4, %v1550_v6  ;;  %v1949_v6 = vld [vmem:[#allocation8 + $0x18] sm:$0xff] }
0x1b18   :  { %2473 = vrot.lane.b32.xlu0 %v2472_v9, %s2723_s2 }
0x1b8a   :  { %v2474_v11 = vpop.permute.xlu0 %2473 }
0x1b8b   :  { %v2476_v12 = vunpack.i.h.bf16 %v2474_v11  ;;  %v2475_v13 = vunpack.i.l.bf16 %v2474_v11 }
0x1b8d   :  { %v2417_v14 = vpack.c.bf16 %v2476_v12, %v2475_v13  ;;  %v1773_v12 = vld [vmem:[#allocation8 + $0xd0] ss:$0 sm:$0xff] }
0x1b8f   :  { %2419 = vmatprep.subr.msk.bf16.mxu1 %vm2418_vm7, %v2417_v14 }
0x1b90   :  { %2422 = vmatpush3.bf16.xpose.msk.msra.mxu1 %vm2418_vm7, %v2417_v14 }
0x1b91   :  { %2436 = vmatprep.subr.bf16.mxu1 %v2435_v56 }
0x1b97   :  { %2207 = vmatmul.mubr.msk.f32.vlgmr.msra.gmra.mrb[10].mxu1 %vm172_vm2, %v1555_v4  ;;  %v1864_v4 = vld [vmem:[#allocation5 + $0xb8] sm:$0xff] }
0x1b98   :  { %2438 = vmatpush3.bf16.msra.mxu1 %v2435_v56  ;;  %v2447_v3 = vpack.c.bf16 %v1864_v4, %v1863_v2 }
0x1b99   :  { %2440 = vmatprep.subr.bf16.mxu1 %v2439_v59 }
0x1b9c   :  { %2442 = vmatpush3.bf16.msra.mxu1 %v2439_v59 }
0x1b9d   :  { %2444 = vmatprep.subr.bf16.mxu1 %v2443_v62 }
0x1ba0   :  { %2446 = vmatpush3.bf16.msra.mxu1 %v2443_v62 }
0x1ba1   :  { %2448 = vmatprep.subr.bf16.mxu1 %v2447_v3 }
0x1ba4   :  { %2450 = vmatpush3.bf16.msra.mxu1 %v2447_v3 }
0x1c6a   :  { %v2208_v8 = vpop.f32.mrb[10].mxu1 }
0x1c6b   :  { %v1648_v15 = vmul.f32 0.17677669, %v2208_v8  ;;  %v1638_v16 = vpop.f32.mrb[11].mxu1 }
0x1c6c   :  { %v1647_v25 = vmul.f32 0.17677669, %v1638_v16 }
0x1c6d   :  { %v1652_v26 = vadd.f32 %v1650_v0, %v1648_v15 }
0x1c6e   :  { %v1651_v29 = vadd.f32 %v1649_v19, %v1647_v25  ;;  %v1951_v19 = vld [vmem:[#allocation8 + $0x78] sm:$0xff]  ;;  %v1952_v25 = vld [vmem:[#allocation8 + $0xa8] sm:$0xff] }
0x1c6f   :  { %v1657_v17 = vsel %vm1653_vm8, %v1652_v26, -inf }
0x1c70   :  { %1658 = vmax.xlane.f32.xlu0 %v1657_v17  ;;  %v1654_v18 = vsel %vm1653_vm8, %v1651_v29, -inf }
0x1c71   :  { %1655 = vmax.xlane.f32.xlu1 %v1654_v18 }
0x1cfd   :  { %v1659_v20 = vpop.xlane.xlu0 %1658 }
0x1cfe   :  { %v1661_v21 = vsub.f32 %v1652_v26, %v1659_v20  ;;  %v1656_v22 = vpop.xlane.xlu1 %1655  ;;  %v2455_v26 = vpack.c.bf16 %v1952_v25, %v1951_v19 }
0x1cff   :  { %v1660_v23 = vsub.f32 %v1651_v29, %v1656_v22  ;;  %v1865_v29 = vld [vmem:[#allocation5 + $0xd0] ss:$0 sm:$0xff] }
0x1d00   :  { %v1664_v24 = vmul.f32 1.442695, %v1661_v21 }
0x1d01   :  { %v1662_v27 = vmul.f32 1.442695, %v1660_v23 }
0x1d02   :  { %2610 = vpow2.f32 %v1664_v24 }
0x1d03   :  { %2612 = vpow2.f32 %v1662_v27 }
0x1d0c   :  { %v2611_v58 = vpop.eup %2610 }
0x1d0d   :  { %v2613_v28 = vpop.eup %2612  ;;  %v1669_v32 = vsel %vm1653_vm8, %v2611_v58, 0.0 }
0x1d0e   :  { %1670 = vadd.xlane.f32.xlu1 %v1669_v32  ;;  %v1666_v33 = vsel %vm1653_vm8, %v2613_v28, 0.0 }
0x1d0f   :  { %1667 = vadd.xlane.f32.xlu0 %v1666_v33 }
0x1d1f   :  { %1368 = vrot.lane.b32.xlu1 %v3012_v7, %s2723_s2  ;;  %v2427_v7 = vpack.c.bf16 %v1770_v37, %v1769_v35 }
0x1d23   :  { %1373 = vrot.lane.b32.xlu1 %v3032_v30, %s2723_s2 }
0x1d25   :  { %2478 = vrot.lane.b32.xlu0 %v2472_v9, %s2722_s1  ;;  %v1950_v9 = vld [vmem:[#allocation8 + $0x48] sm:$0xff] }
0x1d26   :  { %v2451_v11 = vpack.c.bf16 %v1950_v9, %v1949_v6 }
0x1d9b   :  { %v1671_v36 = vpop.xlane.xlu1 %1670 }
0x1d9c   :  { %2614 = vrcp.f32 %v1671_v36  ;;  %v1668_v34 = vpop.xlane.xlu0 %1667 }
0x1d9d   :  { %2616 = vrcp.f32 %v1668_v34 }
0x1d9f   :  { %v1369_v51 = vpop.permute.xlu1 %1368 }
0x1da0   :  { %1371 = vst.msk [vmem:[#allocation11] sm:$0x3] %vm390_vm4, %v1369_v51  ;;  %v2479_v5 = vpop.permute.xlu0 %2478 }
0x1da1   :  { %v2481_v38 = vunpack.i.h.bf16 %v2479_v5  ;;  %v2480_v39 = vunpack.i.l.bf16 %v2479_v5 }
0x1da3   :  { %v2423_v40 = vpack.c.bf16 %v2481_v38, %v2480_v39  ;;  %v1374_v42 = vpop.permute.xlu1 %1373 }
0x1da4   :  { %1377 = vst.msk [vmem:[#allocation11 + $0x2] sm:$0x3] %vm390_vm4, %v1374_v42 }
0x1da5   :  { %2424 = vmatprep.subr.bf16.mxu0 %v2423_v40 }
0x1da6   :  { %v2615_v30 = vpop.eup %2614  ;;  %2426 = vmatpush3.bf16.msra.mxu0 %v2423_v40 }
0x1da7   :  { %v2617_v43 = vpop.eup %2616  ;;  %v1675_v10 = vmul.f32 %v2615_v30, %v1671_v36  ;;  %2428 = vmatprep.subr.bf16.mxu0 %v2427_v7 }
0x1da8   :  { %v1674_v31 = vmul.f32 %v2617_v43, %v1668_v34 }
0x1da9   :  { %v1677_v41 = vsub.f32 2.0, %v1675_v10 }
0x1daa   :  { %v1676_v44 = vsub.f32 2.0, %v1674_v31 }
0x1dab   :  { %v1679_v45 = vmul.f32 %v2615_v30, %v1677_v41 }
0x1dac   :  { %v1678_v46 = vmul.f32 %v2617_v43, %v1676_v44 }
0x1dad   :  { %v1681_v50 = vmul.f32 %v2611_v58, %v1679_v45 }
0x1dae   :  { %v1680_v49 = vmul.f32 %v2613_v28, %v1678_v46 }
0x1db0   :  { %2213 = vmatprep.mubr.msk.f32.mxu0 %vm1653_vm8, %v1680_v49 }
0x1db1   :  { %2214 = vmatmul.mubr.msk.f32.vlgmr.msra.gmra.mrb[14].mxu0 %vm1653_vm8, %v1681_v50 }
0x1db2   :  { %2430 = vmatpush3.bf16.msra.mxu0 %v2427_v7 }
0x1db3   :  { %2432 = vmatprep.subr.bf16.mxu0 %v2431_v52 }
0x1db6   :  { %2434 = vmatpush3.bf16.msra.mxu0 %v2431_v52 }
0x1db7   :  { %2452 = vmatprep.subr.bf16.mxu0 %v2451_v11 }
0x1e84   :  { %v2215_v63 = vpop.f32.mrb[14].mxu0 }
0x1e85   :  { %v1760_v1 = vpop.f32.mrb[15].mxu0 }
0x1e86   :  { %2224 = vmatprep.mubr.msk.f32.mxu0 %vm172_vm2, %v1760_v1 }
0x1e87   :  { %2225 = vmatmul.mubr.msk.f32.vlgmr.msra.gmra.mrb[16].mxu0 %vm172_vm2, %v2215_v63 }
0x1e88   :  { %2454 = vmatpush3.bf16.msra.mxu0 %v2451_v11 }
0x1e89   :  { %2456 = vmatprep.subr.bf16.mxu0 %v2455_v26 }
0x1e8c   :  { %2458 = vmatpush3.bf16.msra.mxu0 %v2455_v26 }
0x1f5a   :  { %v2226_v13 = vpop.f32.mrb[16].mxu0 }
0x1f5b   :  { %v1852_v14 = vadd.f32 %v2226_v13, %v1773_v12  ;;  %v1846_v8 = vpop.f32.mrb[17].mxu0 }
0x1f5c   :  { %v1847_v0 = vadd.f32 %v1846_v8, %v1773_v12 }
0x1f5d   :  { %v1856_v16 = vmax.f32 %v1852_v14, 0.0 }
0x1f5e   :  { %v1855_v15 = vmax.f32 %v1847_v0, 0.0 }
0x1f60   :  { %2243 = vmatprep.mubr.msk.f32.mxu1 %vm174_vm3, %v1855_v15 }
0x1f61   :  { %2244 = vmatmul.mubr.msk.f32.vlgmr.msra.gmra.mrb[12].mxu1 %vm174_vm3, %v1856_v16 }
0x2034   :  { %v2245_v17 = vpop.f32.mrb[12].mxu1 }
0x2035   :  { %v1944_v18 = vadd.f32 %v2245_v17, %v1865_v29  ;;  %v1938_v20 = vpop.f32.mrb[13].mxu1 }
0x2036   :  { %v1939_v21 = vadd.f32 %v1938_v20, %v1865_v29 }
0x2037   :  { %v1948_v23 = vmax.f32 %v1944_v18, 0.0 }
0x2038   :  { %v1947_v22 = vmax.f32 %v1939_v21, 0.0 }
0x203a   :  { %2254 = vmatprep.mubr.msk.f32.mxu0 %vm172_vm2, %v1947_v22 }
0x203b   :  { %2255 = vmatmul.mubr.msk.f32.vlgmr.msra.gmra.mrb[18].mxu0 %vm172_vm2, %v1948_v23 }
0x203c   :  { %2673 = shalt.err (!%p2670_p6)
}
0x203d   :  { %s2674_s23 = scalar_lea.hbm %s3124_s6, 64 }
0x203e   :  { %p2675_p7 = scmp.ne.s32.totalorder %s3124_s6, %s2674_s23  ;;  %p2678_p8 = scmp.lt.u32.totalorder %s2674_s23, %s3124_s6 }
0x2040   :  { %p2680_p9 = pnand %p2678_p8, %p2675_p7 }
0x2042   :  { %2683 = shalt.err (!%p2680_p9)
}
0x2043   :  { %s2726_s27 = smov 2   ;;  %s2684_s4 = scalar_lea.vmem %s2065_s19, 64 }
0x2044   :  { %2058 = dma.vmem_to_hbm [thread:$0]  %s2053_s17, 64, %s3124_s6, [#allocation7], %s2721_s30, %s2721_s30, %s2726_s27  }
0x2045   :  { %p2685_p10 = scmp.ne.s32.totalorder %s2065_s19, %s2684_s4  ;;  %p2689_p11 = scmp.lt.s32.totalorder %s2065_s19, %s2065_s19 }
0x2046   :  { %p2690_p12 = scmp.lt.s32.totalorder %s2684_s4, %s2684_s4 }
0x2048   :  { %p2691_p13 = por %p2690_p12, %p2689_p11 }
0x204a   :  { %p2692_p0 = pnand %p2691_p13, %p2685_p10 }
0x204c   :  { %2695 = shalt.err (!%p2692_p0)
}
0x204d   :  { %s2696_s10 = scalar_lea.hbm %s3125_s7, 64 }
0x204e   :  { %p2697_p1 = scmp.ne.s32.totalorder %s3125_s7, %s2696_s10  ;;  %p2700_p2 = scmp.lt.u32.totalorder %s2696_s10, %s3125_s7 }
0x2050   :  { %p2702_p3 = pnand %p2700_p2, %p2697_p1 }
0x2052   :  { %2705 = shalt.err (!%p2702_p3)
}
0x2053   :  { %2070 = dma.vmem_to_hbm [thread:$0]  %s2065_s19, 64, %s3125_s7, [#allocation12], %s2721_s30, %s2721_s30, %s2726_s27   ;;  %v1953_v24 = vld [vmem:[#allocation8 + $0xd8] ss:$0 sm:$0xff] }
0x210e   :  { %v2256_v27 = vpop.f32.mrb[18].mxu0 }
0x210f   :  { %v2032_v58 = vadd.f32 %v2256_v27, %v1953_v24  ;;  %v2026_v28 = vpop.f32.mrb[19].mxu0 }
0x2110   :  { %v2027_v32 = vadd.f32 %v2026_v28, %v1953_v24 }
0x2111   :  { %v2036_v33 = vmax.f32 %v2032_v58, 0.0 }
0x2112   :  { %v2035_v36 = vmax.f32 %v2027_v32, 0.0 }
0x2113   :  { %2038 = vst.msk [vmem:[#allocation4 + $0x8] sm:$0xff] %vm57_vm1, %v2036_v33 }
0x2114   :  { %2037 = vst.msk [vmem:[#allocation4] sm:$0xff] %vm57_vm1, %v2035_v36 }
0x211b   :  { %v2039_v34 = vld [vmem:[#allocation4] ss:$2 sm:$0xff]  ;;  %v2042_v51 = vld [vmem:[#allocation4 + $0x1] ss:$2 sm:$0xff] }
0x211c   :  { %2040 = vst.msk [vmem:[%s3123_s5] sm:$0xff] %vm57_vm1, %v2039_v34  ;;  %2129 = vst.msk [vmem:[%s3123_s5 + $0x8] sm:$0xff] %vm57_vm1, %v2042_v51 }
0x211d   :  { %2710 = dma.done.wait [#allocation7], 64  }
0x211e   :  { %2711 = vsyncadd [#allocation7], 4294967232 }
0x211f   :  { %2712 = dma.done.wait [#allocation12], 64  }
0x2120   :  { %2713 = vsyncadd [#allocation12], 4294967232 }
0x2121   :  { %2079 = vsyncpa [#allocation6], 1 }
0x2122   :  { %2080 = vsyncpa [#allocation9], 1 }
0x2123   :  { %2081 = vsyncpa [#allocation7], 1 }
0x2124   :  { %2082 = vsyncpa [#allocation12], 1 }

</bundles_post_ra>
